<compile_context>
chip_gen: v5e
topology: v5e:2x2
jax: 0.10.0
libtpu: 0.0.40
codegen_flags: <defaults>
</compile_context>

<pallas_src>
import math

import jax
import jax.numpy as jnp
from jax.experimental import pallas as pl
from jax.experimental.pallas import tpu as pltpu

HIDDEN_DIMS = [12, 128, 128, 64, 256, 64, 256, 64, 32]
INPUT_DIM = 6
OUTPUT_DIM = 1
LANE = 128


def _round_up(n, m):
    return ((n + m - 1) // m) * m


def mlp_kernel(x_ref, b_ref, *refs):
    """Whole-MLP kernel: chained matmul + bias + ReLU, final layer no ReLU.

    refs = (w0, w1, ..., wL, out_ref).  Weights are bf16 (MXU bf16 fast path),
    biases live in one packed f32 (n_layers, 256) array, accumulation is f32.
    """
    out_ref = refs[-1]
    w_refs = refs[:-1]
    n_layers = len(w_refs)

    h = x_ref[...]                                    # (tm, 128) f32
    for i, w_ref in enumerate(w_refs):
        w = w_ref[...]                                # (pi, po) bf16
        po = w.shape[1]
        b = b_ref[i:i + 1, :po]                       # (1, po) f32
        h = jnp.dot(h.astype(w.dtype), w,
                    preferred_element_type=jnp.float32) + b
        if i < n_layers - 1:
            h = jnp.maximum(h, 0.0)
    # NOTE: the final 32->1 layer is mostly zero-padding work on the MXU; it
    # could be a VPU reduction, but the full 128-lane store keeps the output
    # spec lane-dense and the cost is negligible.
    out_ref[...] = h


def init_params(key):
    """PyTorch nn.Linear-style (Kaiming-uniform-ish) deterministic init, fp32."""
    dims = [INPUT_DIM] + HIDDEN_DIMS + [OUTPUT_DIM]
    params = []
    for i in range(len(dims) - 1):
        fan_in, fan_out = dims[i], dims[i + 1]
        key, kw, kb = jax.random.split(key, 3)
        bound = 1.0 / math.sqrt(fan_in)
        w = jax.random.uniform(kw, (fan_in, fan_out), jnp.float32, -bound, bound)
        b = jax.random.uniform(kb, (fan_out,), jnp.float32, -bound, bound)
        params.append((w, b))
    return params


def pad_params(params, matmul_dtype=jnp.bfloat16):
    """Zero-pad each weight to (ceil128(in), ceil128(out)) stored in
    `matmul_dtype`, and pack all biases into one (n_layers, max_padded_out)
    f32 array.

    Zero padding is semantically safe: padded lanes stay exactly zero through
    matmul + zero bias + ReLU, so real output columns are unaffected.
    """
    max_po = max(_round_up(w.shape[1], LANE) for w, _ in params)
    b_pack = jnp.zeros((len(params), max_po), jnp.float32)
    ws = []
    for i, (w, b) in enumerate(params):
        fi, fo = w.shape
        pi, po = _round_up(fi, LANE), _round_up(fo, LANE)
        wp = jnp.zeros((pi, po), jnp.float32).at[:fi, :fo].set(w)
        ws.append(wp.astype(matmul_dtype))
        b_pack = b_pack.at[i, :fo].set(b)
    return ws, b_pack


def _choose_tile(batch, max_tm=512):
    """Small batches: a single grid step with the whole batch resident.
    Large batches: max_tm-row tiles (MXU-filling, >=2 steps for megacore).
    VMEM stays tiny either way (x/out tiles <=0.5 MiB, weights <1 MiB bf16)."""
    bp = _round_up(batch, 8)
    if bp <= max_tm:
        return bp, bp
    return max_tm, _round_up(bp, max_tm)


def mlp_pallas(x, padded_ws, b_pack, *, max_tm=512, single_buffer_weights=True,
               vmem_limit_bytes=None):
    B = x.shape[0]
    tm, Bp = _choose_tile(B, max_tm)
    in_pad = padded_ws[0].shape[0]
    out_pad = padded_ws[-1].shape[1]

    xp = jnp.zeros((Bp, in_pad), jnp.float32).at[:B, :INPUT_DIM].set(
        x.astype(jnp.float32))

    def build(use_single_buffer):
        # Constant-index weight/bias blocks are never re-fetched across grid
        # steps; single-buffering halves their VMEM footprint and drops the
        # per-step buffer-swap bookkeeping.
        const_kw = dict(pipeline_mode=pl.Buffered(1)) if use_single_buffer else {}
        in_specs = [pl.BlockSpec((tm, in_pad), lambda i: (i, 0)),
                    pl.BlockSpec(b_pack.shape, lambda i: (0, 0), **const_kw)]
        for wp in padded_ws:
            in_specs.append(pl.BlockSpec(wp.shape, lambda i: (0, 0), **const_kw))
        out_spec = pl.BlockSpec((tm, out_pad), lambda i: (i, 0))
        return pl.pallas_call(
            mlp_kernel,
            out_shape=jax.ShapeDtypeStruct((Bp, out_pad), jnp.float32),
            grid_spec=pltpu.PrefetchScalarGridSpec(
                num_scalar_prefetch=0,
                grid=(Bp // tm,),
                in_specs=in_specs,
                out_specs=out_spec,
            ),
            compiler_params=pltpu.CompilerParams(
                dimension_semantics=("parallel",),
                vmem_limit_bytes=vmem_limit_bytes),
        )

    try:
        out = build(single_buffer_weights)(xp, b_pack, *padded_ws)
        out = jax.block_until_ready(out)
    except Exception:
        if not single_buffer_weights:
            raise
        # Some jax versions reject Buffered(1); default double-buffering only
        # costs <1 MiB extra VMEM here, so fall back rather than fail.
        out = build(False)(xp, b_pack, *padded_ws)

    return out[:B, :OUTPUT_DIM]


def mlp_reference(x, params, matmul_dtype=jnp.float32):
    h = x.astype(jnp.float32)
    n = len(params)
    for i, (w, b) in enumerate(params):
        h = jnp.dot(h.astype(matmul_dtype), w.astype(matmul_dtype),
                    preferred_element_type=jnp.float32) + b
        if i < n - 1:
            h = jnp.maximum(h, 0.0)
    return h


if __name__ == "__main__":
    key = jax.random.PRNGKey(0)
    key, kx = jax.random.split(key)

    batch = 16
    x = jax.random.normal(kx, (batch, INPUT_DIM), jnp.float32)

    params = init_params(key)
    padded_ws, b_pack = pad_params(params, matmul_dtype=jnp.bfloat16)

    y = mlp_pallas(x, padded_ws, b_pack)
    y = jax.block_until_ready(y)
    assert y.shape == (batch, OUTPUT_DIM), y.shape

    # Check against a reference with identical numerics (bf16 matmul inputs,
    # f32 accumulation) -- should match to MXU rounding.
    y_bf16_ref = mlp_reference(x, params, matmul_dtype=jnp.bfloat16)
    assert jnp.allclose(y, y_bf16_ref, atol=1e-2, rtol=1e-2), (
        float(jnp.max(jnp.abs(y - y_bf16_ref))))

    # Loose sanity check against the pure-f32 PyTorch semantics (bf16 matmul
    # inputs introduce ~1% level differences).
    y_f32_ref = mlp_reference(x, params, matmul_dtype=jnp.float32)
    assert jnp.allclose(y, y_f32_ref, atol=5e-2, rtol=5e-2), (
        float(jnp.max(jnp.abs(y - y_f32_ref))))

    print("KERNEL_OK")
</pallas_src>

<mosaic_0001>
module attributes {stable_mosaic.version = 11 : i64} {
  func.func @mlp_kernel(%arg0: i32, %arg1: memref<16x128xf32, #tpu.memory_space<vmem>>, %arg2: memref<10x256xf32, #tpu.memory_space<vmem>>, %arg3: memref<128x128xbf16, #tpu.memory_space<vmem>>, %arg4: memref<128x128xbf16, #tpu.memory_space<vmem>>, %arg5: memref<128x128xbf16, #tpu.memory_space<vmem>>, %arg6: memref<128x128xbf16, #tpu.memory_space<vmem>>, %arg7: memref<128x256xbf16, #tpu.memory_space<vmem>>, %arg8: memref<256x128xbf16, #tpu.memory_space<vmem>>, %arg9: memref<128x256xbf16, #tpu.memory_space<vmem>>, %arg10: memref<256x128xbf16, #tpu.memory_space<vmem>>, %arg11: memref<128x128xbf16, #tpu.memory_space<vmem>>, %arg12: memref<128x128xbf16, #tpu.memory_space<vmem>>, %arg13: memref<16x128xf32, #tpu.memory_space<vmem>>) attributes {dimension_semantics = [#tpu.dimension_semantics<parallel>], iteration_bounds = array<i64: 1>, scalar_prefetch = 0 : i64, scratch_operands = 0 : i64, tpu.core_type = #tpu.core_type<tc>, window_params = [{transform_indices = @transform_0, window_bounds = array<i64: 16, 128>}, {pipeline_mode = #tpu.pipeline_mode<synchronous>, transform_indices = @transform_1, window_bounds = array<i64: 10, 256>}, {pipeline_mode = #tpu.pipeline_mode<synchronous>, transform_indices = @transform_2, window_bounds = array<i64: 128, 128>}, {pipeline_mode = #tpu.pipeline_mode<synchronous>, transform_indices = @transform_3, window_bounds = array<i64: 128, 128>}, {pipeline_mode = #tpu.pipeline_mode<synchronous>, transform_indices = @transform_4, window_bounds = array<i64: 128, 128>}, {pipeline_mode = #tpu.pipeline_mode<synchronous>, transform_indices = @transform_5, window_bounds = array<i64: 128, 128>}, {pipeline_mode = #tpu.pipeline_mode<synchronous>, transform_indices = @transform_6, window_bounds = array<i64: 128, 256>}, {pipeline_mode = #tpu.pipeline_mode<synchronous>, transform_indices = @transform_7, window_bounds = array<i64: 256, 128>}, {pipeline_mode = #tpu.pipeline_mode<synchronous>, transform_indices = @transform_8, window_bounds = array<i64: 128, 256>}, {pipeline_mode = #tpu.pipeline_mode<synchronous>, transform_indices = @transform_9, window_bounds = array<i64: 256, 128>}, {pipeline_mode = #tpu.pipeline_mode<synchronous>, transform_indices = @transform_10, window_bounds = array<i64: 128, 128>}, {pipeline_mode = #tpu.pipeline_mode<synchronous>, transform_indices = @transform_11, window_bounds = array<i64: 128, 128>}, {transform_indices = @transform_12, window_bounds = array<i64: 16, 128>}]} {
    %c0 = arith.constant 0 : index
    %c0_0 = arith.constant 0 : index
    %0 = vector.load %arg1[%c0, %c0_0] : memref<16x128xf32, #tpu.memory_space<vmem>>, vector<16x128xf32>
    %c0_1 = arith.constant 0 : index
    %c0_2 = arith.constant 0 : index
    %1 = vector.load %arg3[%c0_1, %c0_2] : memref<128x128xbf16, #tpu.memory_space<vmem>>, vector<128x128xbf16>
    %c0_3 = arith.constant 0 : index
    %c0_4 = arith.constant 0 : index
    %2 = vector.load %arg2[%c0_3, %c0_4] : memref<10x256xf32, #tpu.memory_space<vmem>>, vector<1x128xf32>
    %3 = arith.truncf %0 : vector<16x128xf32> to vector<16x128xbf16>
    %cst = arith.constant dense<0.000000e+00> : vector<16x128xf32>
    %4 = tpu.matmul %3, %1, %cst {dimension_numbers = #tpu.dot_dimension_numbers<[1], [0], [0], [1], [0, 0, 1, 1], [], []>} : vector<16x128xbf16>, vector<128x128xbf16>, vector<16x128xf32> -> vector<16x128xf32>
    %5 = vector.broadcast %2 : vector<1x128xf32> to vector<16x128xf32>
    %6 = arith.addf %4, %5 : vector<16x128xf32>
    %cst_5 = arith.constant 0.000000e+00 : f32
    %7 = vector.broadcast %cst_5 : f32 to vector<16x128xf32>
    %8 = arith.maximumf %6, %7 : vector<16x128xf32>
    %c0_6 = arith.constant 0 : index
    %c0_7 = arith.constant 0 : index
    %9 = vector.load %arg4[%c0_6, %c0_7] : memref<128x128xbf16, #tpu.memory_space<vmem>>, vector<128x128xbf16>
    %c1 = arith.constant 1 : index
    %c0_8 = arith.constant 0 : index
    %10 = vector.load %arg2[%c1, %c0_8] : memref<10x256xf32, #tpu.memory_space<vmem>>, vector<1x128xf32>
    %11 = arith.truncf %8 : vector<16x128xf32> to vector<16x128xbf16>
    %cst_9 = arith.constant dense<0.000000e+00> : vector<16x128xf32>
    %12 = tpu.matmul %11, %9, %cst_9 {dimension_numbers = #tpu.dot_dimension_numbers<[1], [0], [0], [1], [0, 0, 1, 1], [], []>} : vector<16x128xbf16>, vector<128x128xbf16>, vector<16x128xf32> -> vector<16x128xf32>
    %13 = vector.broadcast %10 : vector<1x128xf32> to vector<16x128xf32>
    %14 = arith.addf %12, %13 : vector<16x128xf32>
    %cst_10 = arith.constant 0.000000e+00 : f32
    %15 = vector.broadcast %cst_10 : f32 to vector<16x128xf32>
    %16 = arith.maximumf %14, %15 : vector<16x128xf32>
    %c0_11 = arith.constant 0 : index
    %c0_12 = arith.constant 0 : index
    %17 = vector.load %arg5[%c0_11, %c0_12] : memref<128x128xbf16, #tpu.memory_space<vmem>>, vector<128x128xbf16>
    %c2 = arith.constant 2 : index
    %c0_13 = arith.constant 0 : index
    %18 = vector.load %arg2[%c2, %c0_13] : memref<10x256xf32, #tpu.memory_space<vmem>>, vector<1x128xf32>
    %19 = arith.truncf %16 : vector<16x128xf32> to vector<16x128xbf16>
    %cst_14 = arith.constant dense<0.000000e+00> : vector<16x128xf32>
    %20 = tpu.matmul %19, %17, %cst_14 {dimension_numbers = #tpu.dot_dimension_numbers<[1], [0], [0], [1], [0, 0, 1, 1], [], []>} : vector<16x128xbf16>, vector<128x128xbf16>, vector<16x128xf32> -> vector<16x128xf32>
    %21 = vector.broadcast %18 : vector<1x128xf32> to vector<16x128xf32>
    %22 = arith.addf %20, %21 : vector<16x128xf32>
    %cst_15 = arith.constant 0.000000e+00 : f32
    %23 = vector.broadcast %cst_15 : f32 to vector<16x128xf32>
    %24 = arith.maximumf %22, %23 : vector<16x128xf32>
    %c0_16 = arith.constant 0 : index
    %c0_17 = arith.constant 0 : index
    %25 = vector.load %arg6[%c0_16, %c0_17] : memref<128x128xbf16, #tpu.memory_space<vmem>>, vector<128x128xbf16>
    %c3 = arith.constant 3 : index
    %c0_18 = arith.constant 0 : index
    %26 = vector.load %arg2[%c3, %c0_18] : memref<10x256xf32, #tpu.memory_space<vmem>>, vector<1x128xf32>
    %27 = arith.truncf %24 : vector<16x128xf32> to vector<16x128xbf16>
    %cst_19 = arith.constant dense<0.000000e+00> : vector<16x128xf32>
    %28 = tpu.matmul %27, %25, %cst_19 {dimension_numbers = #tpu.dot_dimension_numbers<[1], [0], [0], [1], [0, 0, 1, 1], [], []>} : vector<16x128xbf16>, vector<128x128xbf16>, vector<16x128xf32> -> vector<16x128xf32>
    %29 = vector.broadcast %26 : vector<1x128xf32> to vector<16x128xf32>
    %30 = arith.addf %28, %29 : vector<16x128xf32>
    %cst_20 = arith.constant 0.000000e+00 : f32
    %31 = vector.broadcast %cst_20 : f32 to vector<16x128xf32>
    %32 = arith.maximumf %30, %31 : vector<16x128xf32>
    %c0_21 = arith.constant 0 : index
    %c0_22 = arith.constant 0 : index
    %33 = vector.load %arg7[%c0_21, %c0_22] : memref<128x256xbf16, #tpu.memory_space<vmem>>, vector<128x256xbf16>
    %c4 = arith.constant 4 : index
    %c0_23 = arith.constant 0 : index
    %34 = vector.load %arg2[%c4, %c0_23] : memref<10x256xf32, #tpu.memory_space<vmem>>, vector<1x256xf32>
    %35 = arith.truncf %32 : vector<16x128xf32> to vector<16x128xbf16>
    %cst_24 = arith.constant dense<0.000000e+00> : vector<16x256xf32>
    %36 = tpu.matmul %35, %33, %cst_24 {dimension_numbers = #tpu.dot_dimension_numbers<[1], [0], [0], [1], [0, 0, 1, 1], [], []>} : vector<16x128xbf16>, vector<128x256xbf16>, vector<16x256xf32> -> vector<16x256xf32>
    %37 = vector.broadcast %34 : vector<1x256xf32> to vector<16x256xf32>
    %38 = arith.addf %36, %37 : vector<16x256xf32>
    %cst_25 = arith.constant 0.000000e+00 : f32
    %39 = vector.broadcast %cst_25 : f32 to vector<16x256xf32>
    %40 = arith.maximumf %38, %39 : vector<16x256xf32>
    %c0_26 = arith.constant 0 : index
    %c0_27 = arith.constant 0 : index
    %41 = vector.load %arg8[%c0_26, %c0_27] : memref<256x128xbf16, #tpu.memory_space<vmem>>, vector<256x128xbf16>
    %c5 = arith.constant 5 : index
    %c0_28 = arith.constant 0 : index
    %42 = vector.load %arg2[%c5, %c0_28] : memref<10x256xf32, #tpu.memory_space<vmem>>, vector<1x128xf32>
    %43 = arith.truncf %40 : vector<16x256xf32> to vector<16x256xbf16>
    %cst_29 = arith.constant dense<0.000000e+00> : vector<16x128xf32>
    %44 = tpu.matmul %43, %41, %cst_29 {dimension_numbers = #tpu.dot_dimension_numbers<[1], [0], [0], [1], [0, 0, 1, 1], [], []>} : vector<16x256xbf16>, vector<256x128xbf16>, vector<16x128xf32> -> vector<16x128xf32>
    %45 = vector.broadcast %42 : vector<1x128xf32> to vector<16x128xf32>
    %46 = arith.addf %44, %45 : vector<16x128xf32>
    %cst_30 = arith.constant 0.000000e+00 : f32
    %47 = vector.broadcast %cst_30 : f32 to vector<16x128xf32>
    %48 = arith.maximumf %46, %47 : vector<16x128xf32>
    %c0_31 = arith.constant 0 : index
    %c0_32 = arith.constant 0 : index
    %49 = vector.load %arg9[%c0_31, %c0_32] : memref<128x256xbf16, #tpu.memory_space<vmem>>, vector<128x256xbf16>
    %c6 = arith.constant 6 : index
    %c0_33 = arith.constant 0 : index
    %50 = vector.load %arg2[%c6, %c0_33] : memref<10x256xf32, #tpu.memory_space<vmem>>, vector<1x256xf32>
    %51 = arith.truncf %48 : vector<16x128xf32> to vector<16x128xbf16>
    %cst_34 = arith.constant dense<0.000000e+00> : vector<16x256xf32>
    %52 = tpu.matmul %51, %49, %cst_34 {dimension_numbers = #tpu.dot_dimension_numbers<[1], [0], [0], [1], [0, 0, 1, 1], [], []>} : vector<16x128xbf16>, vector<128x256xbf16>, vector<16x256xf32> -> vector<16x256xf32>
    %53 = vector.broadcast %50 : vector<1x256xf32> to vector<16x256xf32>
    %54 = arith.addf %52, %53 : vector<16x256xf32>
    %cst_35 = arith.constant 0.000000e+00 : f32
    %55 = vector.broadcast %cst_35 : f32 to vector<16x256xf32>
    %56 = arith.maximumf %54, %55 : vector<16x256xf32>
    %c0_36 = arith.constant 0 : index
    %c0_37 = arith.constant 0 : index
    %57 = vector.load %arg10[%c0_36, %c0_37] : memref<256x128xbf16, #tpu.memory_space<vmem>>, vector<256x128xbf16>
    %c7 = arith.constant 7 : index
    %c0_38 = arith.constant 0 : index
    %58 = vector.load %arg2[%c7, %c0_38] : memref<10x256xf32, #tpu.memory_space<vmem>>, vector<1x128xf32>
    %59 = arith.truncf %56 : vector<16x256xf32> to vector<16x256xbf16>
    %cst_39 = arith.constant dense<0.000000e+00> : vector<16x128xf32>
    %60 = tpu.matmul %59, %57, %cst_39 {dimension_numbers = #tpu.dot_dimension_numbers<[1], [0], [0], [1], [0, 0, 1, 1], [], []>} : vector<16x256xbf16>, vector<256x128xbf16>, vector<16x128xf32> -> vector<16x128xf32>
    %61 = vector.broadcast %58 : vector<1x128xf32> to vector<16x128xf32>
    %62 = arith.addf %60, %61 : vector<16x128xf32>
    %cst_40 = arith.constant 0.000000e+00 : f32
    %63 = vector.broadcast %cst_40 : f32 to vector<16x128xf32>
    %64 = arith.maximumf %62, %63 : vector<16x128xf32>
    %c0_41 = arith.constant 0 : index
    %c0_42 = arith.constant 0 : index
    %65 = vector.load %arg11[%c0_41, %c0_42] : memref<128x128xbf16, #tpu.memory_space<vmem>>, vector<128x128xbf16>
    %c8 = arith.constant 8 : index
    %c0_43 = arith.constant 0 : index
    %66 = vector.load %arg2[%c8, %c0_43] : memref<10x256xf32, #tpu.memory_space<vmem>>, vector<1x128xf32>
    %67 = arith.truncf %64 : vector<16x128xf32> to vector<16x128xbf16>
    %cst_44 = arith.constant dense<0.000000e+00> : vector<16x128xf32>
    %68 = tpu.matmul %67, %65, %cst_44 {dimension_numbers = #tpu.dot_dimension_numbers<[1], [0], [0], [1], [0, 0, 1, 1], [], []>} : vector<16x128xbf16>, vector<128x128xbf16>, vector<16x128xf32> -> vector<16x128xf32>
    %69 = vector.broadcast %66 : vector<1x128xf32> to vector<16x128xf32>
    %70 = arith.addf %68, %69 : vector<16x128xf32>
    %cst_45 = arith.constant 0.000000e+00 : f32
    %71 = vector.broadcast %cst_45 : f32 to vector<16x128xf32>
    %72 = arith.maximumf %70, %71 : vector<16x128xf32>
    %c0_46 = arith.constant 0 : index
    %c0_47 = arith.constant 0 : index
    %73 = vector.load %arg12[%c0_46, %c0_47] : memref<128x128xbf16, #tpu.memory_space<vmem>>, vector<128x128xbf16>
    %c9 = arith.constant 9 : index
    %c0_48 = arith.constant 0 : index
    %74 = vector.load %arg2[%c9, %c0_48] : memref<10x256xf32, #tpu.memory_space<vmem>>, vector<1x128xf32>
    %75 = arith.truncf %72 : vector<16x128xf32> to vector<16x128xbf16>
    %cst_49 = arith.constant dense<0.000000e+00> : vector<16x128xf32>
    %76 = tpu.matmul %75, %73, %cst_49 {dimension_numbers = #tpu.dot_dimension_numbers<[1], [0], [0], [1], [0, 0, 1, 1], [], []>} : vector<16x128xbf16>, vector<128x128xbf16>, vector<16x128xf32> -> vector<16x128xf32>
    %77 = vector.broadcast %74 : vector<1x128xf32> to vector<16x128xf32>
    %78 = arith.addf %76, %77 : vector<16x128xf32>
    %c0_50 = arith.constant 0 : index
    %c0_51 = arith.constant 0 : index
    %79 = vector.load %arg13[%c0_50, %c0_51] : memref<16x128xf32, #tpu.memory_space<vmem>>, vector<16x128xf32>
    tpu.vector_store %arg13[%c0_50, %c0_51], %78 {strides = array<i32>} : memref<16x128xf32, #tpu.memory_space<vmem>>, vector<16x128xf32>,
    return
  }
  func.func @transform_0(%arg0: i32) -> (i32, i32) {
    %c0_i32 = arith.constant 0 : i32
    %c0_i32_0 = arith.constant 0 : i32
    return %arg0, %c0_i32 : i32, i32
  }
  func.func @transform_1(%arg0: i32) -> (i32, i32) {
    %c0_i32 = arith.constant 0 : i32
    %c0_i32_0 = arith.constant 0 : i32
    %c0_i32_1 = arith.constant 0 : i32
    return %c0_i32, %c0_i32_0 : i32, i32
  }
  func.func @transform_2(%arg0: i32) -> (i32, i32) {
    %c0_i32 = arith.constant 0 : i32
    %c0_i32_0 = arith.constant 0 : i32
    %c0_i32_1 = arith.constant 0 : i32
    return %c0_i32, %c0_i32_0 : i32, i32
  }
  func.func @transform_3(%arg0: i32) -> (i32, i32) {
    %c0_i32 = arith.constant 0 : i32
    %c0_i32_0 = arith.constant 0 : i32
    %c0_i32_1 = arith.constant 0 : i32
    return %c0_i32, %c0_i32_0 : i32, i32
  }
  func.func @transform_4(%arg0: i32) -> (i32, i32) {
    %c0_i32 = arith.constant 0 : i32
    %c0_i32_0 = arith.constant 0 : i32
    %c0_i32_1 = arith.constant 0 : i32
    return %c0_i32, %c0_i32_0 : i32, i32
  }
  func.func @transform_5(%arg0: i32) -> (i32, i32) {
    %c0_i32 = arith.constant 0 : i32
    %c0_i32_0 = arith.constant 0 : i32
    %c0_i32_1 = arith.constant 0 : i32
    return %c0_i32, %c0_i32_0 : i32, i32
  }
  func.func @transform_6(%arg0: i32) -> (i32, i32) {
    %c0_i32 = arith.constant 0 : i32
    %c0_i32_0 = arith.constant 0 : i32
    %c0_i32_1 = arith.constant 0 : i32
    return %c0_i32, %c0_i32_0 : i32, i32
  }
  func.func @transform_7(%arg0: i32) -> (i32, i32) {
    %c0_i32 = arith.constant 0 : i32
    %c0_i32_0 = arith.constant 0 : i32
    %c0_i32_1 = arith.constant 0 : i32
    return %c0_i32, %c0_i32_0 : i32, i32
  }
  func.func @transform_8(%arg0: i32) -> (i32, i32) {
    %c0_i32 = arith.constant 0 : i32
    %c0_i32_0 = arith.constant 0 : i32
    %c0_i32_1 = arith.constant 0 : i32
    return %c0_i32, %c0_i32_0 : i32, i32
  }
  func.func @transform_9(%arg0: i32) -> (i32, i32) {
    %c0_i32 = arith.constant 0 : i32
    %c0_i32_0 = arith.constant 0 : i32
    %c0_i32_1 = arith.constant 0 : i32
    return %c0_i32, %c0_i32_0 : i32, i32
  }
  func.func @transform_10(%arg0: i32) -> (i32, i32) {
    %c0_i32 = arith.constant 0 : i32
    %c0_i32_0 = arith.constant 0 : i32
    %c0_i32_1 = arith.constant 0 : i32
    return %c0_i32, %c0_i32_0 : i32, i32
  }
  func.func @transform_11(%arg0: i32) -> (i32, i32) {
    %c0_i32 = arith.constant 0 : i32
    %c0_i32_0 = arith.constant 0 : i32
    %c0_i32_1 = arith.constant 0 : i32
    return %c0_i32, %c0_i32_0 : i32, i32
  }
  func.func @transform_12(%arg0: i32) -> (i32, i32) {
    %c0_i32 = arith.constant 0 : i32
    %c0_i32_0 = arith.constant 0 : i32
    return %arg0, %c0_i32 : i32, i32
  }
}

module attributes {stable_mosaic.version = 11 : i64} {
  func.func @mlp_kernel(%arg0: i32, %arg1: memref<16x128xf32, #tpu.memory_space<vmem>>, %arg2: memref<10x256xf32, #tpu.memory_space<vmem>>, %arg3: memref<128x128xbf16, #tpu.memory_space<vmem>>, %arg4: memref<128x128xbf16, #tpu.memory_space<vmem>>, %arg5: memref<128x128xbf16, #tpu.memory_space<vmem>>, %arg6: memref<128x128xbf16, #tpu.memory_space<vmem>>, %arg7: memref<128x256xbf16, #tpu.memory_space<vmem>>, %arg8: memref<256x128xbf16, #tpu.memory_space<vmem>>, %arg9: memref<128x256xbf16, #tpu.memory_space<vmem>>, %arg10: memref<256x128xbf16, #tpu.memory_space<vmem>>, %arg11: memref<128x128xbf16, #tpu.memory_space<vmem>>, %arg12: memref<128x128xbf16, #tpu.memory_space<vmem>>, %arg13: memref<16x128xf32, #tpu.memory_space<vmem>>) attributes {dimension_semantics = [#tpu.dimension_semantics<parallel>], iteration_bounds = array<i64: 1>, scalar_prefetch = 0 : i64, scratch_operands = 0 : i64, tpu.core_type = #tpu.core_type<tc>, window_params = [{transform_indices = @transform_0, window_bounds = array<i64: 16, 128>}, {pipeline_mode = #tpu.pipeline_mode<synchronous>, transform_indices = @transform_1, window_bounds = array<i64: 10, 256>}, {pipeline_mode = #tpu.pipeline_mode<synchronous>, transform_indices = @transform_2, window_bounds = array<i64: 128, 128>}, {pipeline_mode = #tpu.pipeline_mode<synchronous>, transform_indices = @transform_3, window_bounds = array<i64: 128, 128>}, {pipeline_mode = #tpu.pipeline_mode<synchronous>, transform_indices = @transform_4, window_bounds = array<i64: 128, 128>}, {pipeline_mode = #tpu.pipeline_mode<synchronous>, transform_indices = @transform_5, window_bounds = array<i64: 128, 128>}, {pipeline_mode = #tpu.pipeline_mode<synchronous>, transform_indices = @transform_6, window_bounds = array<i64: 128, 256>}, {pipeline_mode = #tpu.pipeline_mode<synchronous>, transform_indices = @transform_7, window_bounds = array<i64: 256, 128>}, {pipeline_mode = #tpu.pipeline_mode<synchronous>, transform_indices = @transform_8, window_bounds = array<i64: 128, 256>}, {pipeline_mode = #tpu.pipeline_mode<synchronous>, transform_indices = @transform_9, window_bounds = array<i64: 256, 128>}, {pipeline_mode = #tpu.pipeline_mode<synchronous>, transform_indices = @transform_10, window_bounds = array<i64: 128, 128>}, {pipeline_mode = #tpu.pipeline_mode<synchronous>, transform_indices = @transform_11, window_bounds = array<i64: 128, 128>}, {transform_indices = @transform_12, window_bounds = array<i64: 16, 128>}]} {
    %c0 = arith.constant 0 : index
    %c0_0 = arith.constant 0 : index
    %0 = vector.load %arg1[%c0, %c0_0] : memref<16x128xf32, #tpu.memory_space<vmem>>, vector<16x128xf32>
    %c0_1 = arith.constant 0 : index
    %c0_2 = arith.constant 0 : index
    %1 = vector.load %arg3[%c0_1, %c0_2] : memref<128x128xbf16, #tpu.memory_space<vmem>>, vector<128x128xbf16>
    %c0_3 = arith.constant 0 : index
    %c0_4 = arith.constant 0 : index
    %2 = vector.load %arg2[%c0_3, %c0_4] : memref<10x256xf32, #tpu.memory_space<vmem>>, vector<1x128xf32>
    %3 = arith.truncf %0 : vector<16x128xf32> to vector<16x128xbf16>
    %cst = arith.constant dense<0.000000e+00> : vector<16x128xf32>
    %4 = tpu.matmul %3, %1, %cst {dimension_numbers = #tpu.dot_dimension_numbers<[1], [0], [0], [1], [0, 0, 1, 1], [], []>} : vector<16x128xbf16>, vector<128x128xbf16>, vector<16x128xf32> -> vector<16x128xf32>
    %5 = vector.broadcast %2 : vector<1x128xf32> to vector<16x128xf32>
    %6 = arith.addf %4, %5 : vector<16x128xf32>
    %cst_5 = arith.constant 0.000000e+00 : f32
    %7 = vector.broadcast %cst_5 : f32 to vector<16x128xf32>
    %8 = arith.maximumf %6, %7 : vector<16x128xf32>
    %c0_6 = arith.constant 0 : index
    %c0_7 = arith.constant 0 : index
    %9 = vector.load %arg4[%c0_6, %c0_7] : memref<128x128xbf16, #tpu.memory_space<vmem>>, vector<128x128xbf16>
    %c1 = arith.constant 1 : index
    %c0_8 = arith.constant 0 : index
    %10 = vector.load %arg2[%c1, %c0_8] : memref<10x256xf32, #tpu.memory_space<vmem>>, vector<1x128xf32>
    %11 = arith.truncf %8 : vector<16x128xf32> to vector<16x128xbf16>
    %cst_9 = arith.constant dense<0.000000e+00> : vector<16x128xf32>
    %12 = tpu.matmul %11, %9, %cst_9 {dimension_numbers = #tpu.dot_dimension_numbers<[1], [0], [0], [1], [0, 0, 1, 1], [], []>} : vector<16x128xbf16>, vector<128x128xbf16>, vector<16x128xf32> -> vector<16x128xf32>
    %13 = vector.broadcast %10 : vector<1x128xf32> to vector<16x128xf32>
    %14 = arith.addf %12, %13 : vector<16x128xf32>
    %cst_10 = arith.constant 0.000000e+00 : f32
    %15 = vector.broadcast %cst_10 : f32 to vector<16x128xf32>
    %16 = arith.maximumf %14, %15 : vector<16x128xf32>
    %c0_11 = arith.constant 0 : index
    %c0_12 = arith.constant 0 : index
    %17 = vector.load %arg5[%c0_11, %c0_12] : memref<128x128xbf16, #tpu.memory_space<vmem>>, vector<128x128xbf16>
    %c2 = arith.constant 2 : index
    %c0_13 = arith.constant 0 : index
    %18 = vector.load %arg2[%c2, %c0_13] : memref<10x256xf32, #tpu.memory_space<vmem>>, vector<1x128xf32>
    %19 = arith.truncf %16 : vector<16x128xf32> to vector<16x128xbf16>
    %cst_14 = arith.constant dense<0.000000e+00> : vector<16x128xf32>
    %20 = tpu.matmul %19, %17, %cst_14 {dimension_numbers = #tpu.dot_dimension_numbers<[1], [0], [0], [1], [0, 0, 1, 1], [], []>} : vector<16x128xbf16>, vector<128x128xbf16>, vector<16x128xf32> -> vector<16x128xf32>
    %21 = vector.broadcast %18 : vector<1x128xf32> to vector<16x128xf32>
    %22 = arith.addf %20, %21 : vector<16x128xf32>
    %cst_15 = arith.constant 0.000000e+00 : f32
    %23 = vector.broadcast %cst_15 : f32 to vector<16x128xf32>
    %24 = arith.maximumf %22, %23 : vector<16x128xf32>
    %c0_16 = arith.constant 0 : index
    %c0_17 = arith.constant 0 : index
    %25 = vector.load %arg6[%c0_16, %c0_17] : memref<128x128xbf16, #tpu.memory_space<vmem>>, vector<128x128xbf16>
    %c3 = arith.constant 3 : index
    %c0_18 = arith.constant 0 : index
    %26 = vector.load %arg2[%c3, %c0_18] : memref<10x256xf32, #tpu.memory_space<vmem>>, vector<1x128xf32>
    %27 = arith.truncf %24 : vector<16x128xf32> to vector<16x128xbf16>
    %cst_19 = arith.constant dense<0.000000e+00> : vector<16x128xf32>
    %28 = tpu.matmul %27, %25, %cst_19 {dimension_numbers = #tpu.dot_dimension_numbers<[1], [0], [0], [1], [0, 0, 1, 1], [], []>} : vector<16x128xbf16>, vector<128x128xbf16>, vector<16x128xf32> -> vector<16x128xf32>
    %29 = vector.broadcast %26 : vector<1x128xf32> to vector<16x128xf32>
    %30 = arith.addf %28, %29 : vector<16x128xf32>
    %cst_20 = arith.constant 0.000000e+00 : f32
    %31 = vector.broadcast %cst_20 : f32 to vector<16x128xf32>
    %32 = arith.maximumf %30, %31 : vector<16x128xf32>
    %c0_21 = arith.constant 0 : index
    %c0_22 = arith.constant 0 : index
    %33 = vector.load %arg7[%c0_21, %c0_22] : memref<128x256xbf16, #tpu.memory_space<vmem>>, vector<128x256xbf16>
    %c4 = arith.constant 4 : index
    %c0_23 = arith.constant 0 : index
    %34 = vector.load %arg2[%c4, %c0_23] : memref<10x256xf32, #tpu.memory_space<vmem>>, vector<1x256xf32>
    %35 = arith.truncf %32 : vector<16x128xf32> to vector<16x128xbf16>
    %cst_24 = arith.constant dense<0.000000e+00> : vector<16x256xf32>
    %36 = tpu.matmul %35, %33, %cst_24 {dimension_numbers = #tpu.dot_dimension_numbers<[1], [0], [0], [1], [0, 0, 1, 1], [], []>} : vector<16x128xbf16>, vector<128x256xbf16>, vector<16x256xf32> -> vector<16x256xf32>
    %37 = vector.broadcast %34 : vector<1x256xf32> to vector<16x256xf32>
    %38 = arith.addf %36, %37 : vector<16x256xf32>
    %cst_25 = arith.constant 0.000000e+00 : f32
    %39 = vector.broadcast %cst_25 : f32 to vector<16x256xf32>
    %40 = arith.maximumf %38, %39 : vector<16x256xf32>
    %c0_26 = arith.constant 0 : index
    %c0_27 = arith.constant 0 : index
    %41 = vector.load %arg8[%c0_26, %c0_27] : memref<256x128xbf16, #tpu.memory_space<vmem>>, vector<256x128xbf16>
    %c5 = arith.constant 5 : index
    %c0_28 = arith.constant 0 : index
    %42 = vector.load %arg2[%c5, %c0_28] : memref<10x256xf32, #tpu.memory_space<vmem>>, vector<1x128xf32>
    %43 = arith.truncf %40 : vector<16x256xf32> to vector<16x256xbf16>
    %cst_29 = arith.constant dense<0.000000e+00> : vector<16x128xf32>
    %44 = tpu.matmul %43, %41, %cst_29 {dimension_numbers = #tpu.dot_dimension_numbers<[1], [0], [0], [1], [0, 0, 1, 1], [], []>} : vector<16x256xbf16>, vector<256x128xbf16>, vector<16x128xf32> -> vector<16x128xf32>
    %45 = vector.broadcast %42 : vector<1x128xf32> to vector<16x128xf32>
    %46 = arith.addf %44, %45 : vector<16x128xf32>
    %cst_30 = arith.constant 0.000000e+00 : f32
    %47 = vector.broadcast %cst_30 : f32 to vector<16x128xf32>
    %48 = arith.maximumf %46, %47 : vector<16x128xf32>
    %c0_31 = arith.constant 0 : index
    %c0_32 = arith.constant 0 : index
    %49 = vector.load %arg9[%c0_31, %c0_32] : memref<128x256xbf16, #tpu.memory_space<vmem>>, vector<128x256xbf16>
    %c6 = arith.constant 6 : index
    %c0_33 = arith.constant 0 : index
    %50 = vector.load %arg2[%c6, %c0_33] : memref<10x256xf32, #tpu.memory_space<vmem>>, vector<1x256xf32>
    %51 = arith.truncf %48 : vector<16x128xf32> to vector<16x128xbf16>
    %cst_34 = arith.constant dense<0.000000e+00> : vector<16x256xf32>
    %52 = tpu.matmul %51, %49, %cst_34 {dimension_numbers = #tpu.dot_dimension_numbers<[1], [0], [0], [1], [0, 0, 1, 1], [], []>} : vector<16x128xbf16>, vector<128x256xbf16>, vector<16x256xf32> -> vector<16x256xf32>
    %53 = vector.broadcast %50 : vector<1x256xf32> to vector<16x256xf32>
    %54 = arith.addf %52, %53 : vector<16x256xf32>
    %cst_35 = arith.constant 0.000000e+00 : f32
    %55 = vector.broadcast %cst_35 : f32 to vector<16x256xf32>
    %56 = arith.maximumf %54, %55 : vector<16x256xf32>
    %c0_36 = arith.constant 0 : index
    %c0_37 = arith.constant 0 : index
    %57 = vector.load %arg10[%c0_36, %c0_37] : memref<256x128xbf16, #tpu.memory_space<vmem>>, vector<256x128xbf16>
    %c7 = arith.constant 7 : index
    %c0_38 = arith.constant 0 : index
    %58 = vector.load %arg2[%c7, %c0_38] : memref<10x256xf32, #tpu.memory_space<vmem>>, vector<1x128xf32>
    %59 = arith.truncf %56 : vector<16x256xf32> to vector<16x256xbf16>
    %cst_39 = arith.constant dense<0.000000e+00> : vector<16x128xf32>
    %60 = tpu.matmul %59, %57, %cst_39 {dimension_numbers = #tpu.dot_dimension_numbers<[1], [0], [0], [1], [0, 0, 1, 1], [], []>} : vector<16x256xbf16>, vector<256x128xbf16>, vector<16x128xf32> -> vector<16x128xf32>
    %61 = vector.broadcast %58 : vector<1x128xf32> to vector<16x128xf32>
    %62 = arith.addf %60, %61 : vector<16x128xf32>
    %cst_40 = arith.constant 0.000000e+00 : f32
    %63 = vector.broadcast %cst_40 : f32 to vector<16x128xf32>
    %64 = arith.maximumf %62, %63 : vector<16x128xf32>
    %c0_41 = arith.constant 0 : index
    %c0_42 = arith.constant 0 : index
    %65 = vector.load %arg11[%c0_41, %c0_42] : memref<128x128xbf16, #tpu.memory_space<vmem>>, vector<128x128xbf16>
    %c8 = arith.constant 8 : index
    %c0_43 = arith.constant 0 : index
    %66 = vector.load %arg2[%c8, %c0_43] : memref<10x256xf32, #tpu.memory_space<vmem>>, vector<1x128xf32>
    %67 = arith.truncf %64 : vector<16x128xf32> to vector<16x128xbf16>
    %cst_44 = arith.constant dense<0.000000e+00> : vector<16x128xf32>
    %68 = tpu.matmul %67, %65, %cst_44 {dimension_numbers = #tpu.dot_dimension_numbers<[1], [0], [0], [1], [0, 0, 1, 1], [], []>} : vector<16x128xbf16>, vector<128x128xbf16>, vector<16x128xf32> -> vector<16x128xf32>
    %69 = vector.broadcast %66 : vector<1x128xf32> to vector<16x128xf32>
    %70 = arith.addf %68, %69 : vector<16x128xf32>
    %cst_45 = arith.constant 0.000000e+00 : f32
    %71 = vector.broadcast %cst_45 : f32 to vector<16x128xf32>
    %72 = arith.maximumf %70, %71 : vector<16x128xf32>
    %c0_46 = arith.constant 0 : index
    %c0_47 = arith.constant 0 : index
    %73 = vector.load %arg12[%c0_46, %c0_47] : memref<128x128xbf16, #tpu.memory_space<vmem>>, vector<128x128xbf16>
    %c9 = arith.constant 9 : index
    %c0_48 = arith.constant 0 : index
    %74 = vector.load %arg2[%c9, %c0_48] : memref<10x256xf32, #tpu.memory_space<vmem>>, vector<1x128xf32>
    %75 = arith.truncf %72 : vector<16x128xf32> to vector<16x128xbf16>
    %cst_49 = arith.constant dense<0.000000e+00> : vector<16x128xf32>
    %76 = tpu.matmul %75, %73, %cst_49 {dimension_numbers = #tpu.dot_dimension_numbers<[1], [0], [0], [1], [0, 0, 1, 1], [], []>} : vector<16x128xbf16>, vector<128x128xbf16>, vector<16x128xf32> -> vector<16x128xf32>
    %77 = vector.broadcast %74 : vector<1x128xf32> to vector<16x128xf32>
    %78 = arith.addf %76, %77 : vector<16x128xf32>
    %c0_50 = arith.constant 0 : index
    %c0_51 = arith.constant 0 : index
    %79 = vector.load %arg13[%c0_50, %c0_51] : memref<16x128xf32, #tpu.memory_space<vmem>>, vector<16x128xf32>
    tpu.vector_store %arg13[%c0_50, %c0_51], %78 {strides = array<i32>} : memref<16x128xf32, #tpu.memory_space<vmem>>, vector<16x128xf32>,
    return
  }
  func.func @transform_0(%arg0: i32) -> (i32, i32) {
    %c0_i32 = arith.constant 0 : i32
    %c0_i32_0 = arith.constant 0 : i32
    return %arg0, %c0_i32 : i32, i32
  }
  func.func @transform_1(%arg0: i32) -> (i32, i32) {
    %c0_i32 = arith.constant 0 : i32
    %c0_i32_0 = arith.constant 0 : i32
    %c0_i32_1 = arith.constant 0 : i32
    return %c0_i32, %c0_i32_0 : i32, i32
  }
  func.func @transform_2(%arg0: i32) -> (i32, i32) {
    %c0_i32 = arith.constant 0 : i32
    %c0_i32_0 = arith.constant 0 : i32
    %c0_i32_1 = arith.constant 0 : i32
    return %c0_i32, %c0_i32_0 : i32, i32
  }
  func.func @transform_3(%arg0: i32) -> (i32, i32) {
    %c0_i32 = arith.constant 0 : i32
    %c0_i32_0 = arith.constant 0 : i32
    %c0_i32_1 = arith.constant 0 : i32
    return %c0_i32, %c0_i32_0 : i32, i32
  }
  func.func @transform_4(%arg0: i32) -> (i32, i32) {
    %c0_i32 = arith.constant 0 : i32
    %c0_i32_0 = arith.constant 0 : i32
    %c0_i32_1 = arith.constant 0 : i32
    return %c0_i32, %c0_i32_0 : i32, i32
  }
  func.func @transform_5(%arg0: i32) -> (i32, i32) {
    %c0_i32 = arith.constant 0 : i32
    %c0_i32_0 = arith.constant 0 : i32
    %c0_i32_1 = arith.constant 0 : i32
    return %c0_i32, %c0_i32_0 : i32, i32
  }
  func.func @transform_6(%arg0: i32) -> (i32, i32) {
    %c0_i32 = arith.constant 0 : i32
    %c0_i32_0 = arith.constant 0 : i32
    %c0_i32_1 = arith.constant 0 : i32
    return %c0_i32, %c0_i32_0 : i32, i32
  }
  func.func @transform_7(%arg0: i32) -> (i32, i32) {
    %c0_i32 = arith.constant 0 : i32
    %c0_i32_0 = arith.constant 0 : i32
    %c0_i32_1 = arith.constant 0 : i32
    return %c0_i32, %c0_i32_0 : i32, i32
  }
  func.func @transform_8(%arg0: i32) -> (i32, i32) {
    %c0_i32 = arith.constant 0 : i32
    %c0_i32_0 = arith.constant 0 : i32
    %c0_i32_1 = arith.constant 0 : i32
    return %c0_i32, %c0_i32_0 : i32, i32
  }
  func.func @transform_9(%arg0: i32) -> (i32, i32) {
    %c0_i32 = arith.constant 0 : i32
    %c0_i32_0 = arith.constant 0 : i32
    %c0_i32_1 = arith.constant 0 : i32
    return %c0_i32, %c0_i32_0 : i32, i32
  }
  func.func @transform_10(%arg0: i32) -> (i32, i32) {
    %c0_i32 = arith.constant 0 : i32
    %c0_i32_0 = arith.constant 0 : i32
    %c0_i32_1 = arith.constant 0 : i32
    return %c0_i32, %c0_i32_0 : i32, i32
  }
  func.func @transform_11(%arg0: i32) -> (i32, i32) {
    %c0_i32 = arith.constant 0 : i32
    %c0_i32_0 = arith.constant 0 : i32
    %c0_i32_1 = arith.constant 0 : i32
    return %c0_i32, %c0_i32_0 : i32, i32
  }
  func.func @transform_12(%arg0: i32) -> (i32, i32) {
    %c0_i32 = arith.constant 0 : i32
    %c0_i32_0 = arith.constant 0 : i32
    return %arg0, %c0_i32 : i32, i32
  }
}

</mosaic_0001>

<bundles_post_ra>
// kernel: tpu_custom_call.1
= control target key start
LH: loop header
LB: loop body
LE: loop exit
PB: predicated region body
PF: predicated region fallthrough
CT: control target
= control target key end

     0   :  { %17 = vsyncpa [#allocation3], 0  ;;  %s2408_s0 = inlined_call_operand.hbm [shape: f32[16,128], index: 0, kind: input, shape index: {}]   ;;  %s2409_s1 = inlined_call_operand.hbm [shape: f32[10,256], index: 1, kind: input, shape index: {}]   ;;  %s2410_s2 = inlined_call_operand.hbm [shape: bf16[128,128], index: 2, kind: input, shape index: {}]   ;;  %s2411_s3 = inlined_call_operand.hbm [shape: bf16[128,128], index: 3, kind: input, shape index: {}]   ;;  %s2412_s4 = inlined_call_operand.hbm [shape: bf16[128,128], index: 4, kind: input, shape index: {}]   ;;  %s2413_s5 = inlined_call_operand.hbm [shape: bf16[128,128], index: 5, kind: input, shape index: {}]   ;;  %s2414_s6 = inlined_call_operand.hbm [shape: bf16[128,256], index: 6, kind: input, shape index: {}]   ;;  %s2415_s7 = inlined_call_operand.hbm [shape: bf16[256,128], index: 7, kind: input, shape index: {}]   ;;  %s2416_s8 = inlined_call_operand.hbm [shape: bf16[128,256], index: 8, kind: input, shape index: {}]   ;;  %s2417_s9 = inlined_call_operand.hbm [shape: bf16[256,128], index: 9, kind: input, shape index: {}]   ;;  %s2418_s10 = inlined_call_operand.hbm [shape: bf16[128,128], index: 10, kind: input, shape index: {}]   ;;  %s2419_s11 = inlined_call_operand.hbm [shape: bf16[128,128], index: 11, kind: input, shape index: {}]   ;;  %s2420_s12 = inlined_call_operand.hbm [shape: f32[16,128], index: 12, kind: output, shape index: {}]  }
   0x1   :  { %18 = vsyncpa [#allocation6], 0 }
   0x2   :  { %19 = vsyncpa [#allocation9], 0 }
   0x3   :  { %20 = vsyncpa [#allocation12], 0 }
   0x4   :  { %21 = vsyncpa [#allocation15], 0 }
   0x5   :  { %22 = vsyncpa [#allocation18], 0 }
   0x6   :  { %23 = vsyncpa [#allocation21], 0  ;;  %s42_s23 = sshll.u32 %s2409_s1, 4  ;;  %s43_s23 = int_to_ptr.hbm [resolvable:$true] %s42_s23 }
   0x7   :  { %24 = vsyncpa [#allocation4], 0  ;;  %s2249_s24 = smov [#allocation5]   ;;  %s2250_s26 = smov 256  }
   0x8   :  { %s44_s25 = sshll.u32 %s2249_s24, 4  ;;  %s2251_s27 = smov 16   ;;  %s45_s25 = int_to_ptr.vmem [resolvable:$true] %s44_s25 }
   0x9   :  { %50 = dma.hbm_to_vmem [thread:$0]  %s43_s23, 512, %s45_s25, [#allocation6], %s2250_s26, %s2250_s26, %s2251_s27  }
   0xa   :  { %s68_s30 = sshll.u32 %s2411_s3, 4  ;;  %s2252_s13 = smov [#allocation8]   ;;  %s69_s30 = int_to_ptr.hbm [resolvable:$true] %s68_s30 }
   0xb   :  { %s70_s14 = sshll.u32 %s2252_s13, 4  ;;  %s94_s17 = sshll.u32 %s2413_s5, 4  ;;  %s71_s14 = int_to_ptr.vmem [resolvable:$true] %s70_s14  ;;  %s95_s17 = int_to_ptr.hbm [resolvable:$true] %s94_s17 }
   0xc   :  { %s2253_s1 = smov 64   ;;  %s2254_s18 = smov 4  }
   0xd   :  { %76 = dma.hbm_to_vmem [thread:$0]  %s69_s30, 1024, %s71_s14, [#allocation9], %s2253_s1, %s2253_s1, %s2254_s18  }
   0xe   :  { %s120_s21 = sshll.u32 %s2415_s7, 4  ;;  %s2255_s3 = smov [#allocation11]   ;;  %s121_s21 = int_to_ptr.hbm [resolvable:$true] %s120_s21 }
   0xf   :  { %s96_s22 = sshll.u32 %s2255_s3, 4  ;;  %s2256_s5 = smov [#allocation14]   ;;  %s97_s22 = int_to_ptr.vmem [resolvable:$true] %s96_s22 }
  0x10   :  { %102 = dma.hbm_to_vmem [thread:$0]  %s95_s17, 1024, %s97_s22, [#allocation12], %s2253_s1, %s2253_s1, %s2254_s18  }
  0x11   :  { %s122_s23 = sshll.u32 %s2256_s5, 4  ;;  %s146_s26 = sshll.u32 %s2417_s9, 4  ;;  %s123_s23 = int_to_ptr.vmem [resolvable:$true] %s122_s23  ;;  %s147_s26 = int_to_ptr.hbm [resolvable:$true] %s146_s26 }
  0x12   :  { %128 = dma.hbm_to_vmem [thread:$0]  %s121_s21, 2048, %s123_s23, [#allocation15], %s2253_s1, %s2253_s1, %s2254_s18  }
  0x13   :  { %s29_s28 = sshll.u32 %s2408_s0, 4  ;;  %s2257_s29 = smov [#allocation17]   ;;  %s30_s28 = int_to_ptr.hbm [resolvable:$true] %s29_s28 }
  0x14   :  { %s148_s30 = sshll.u32 %s2257_s29, 4  ;;  %s2258_s13 = smov [#allocation2]   ;;  %s149_s30 = int_to_ptr.vmem [resolvable:$true] %s148_s30 }
  0x15   :  { %154 = dma.hbm_to_vmem [thread:$0]  %s147_s26, 2048, %s149_s30, [#allocation18], %s2253_s1, %s2253_s1, %s2254_s18  }
  0x16   :  { %s31_s9 = sshll.u32 %s2258_s13, 4  ;;  %s2259_s14 = smov 128   ;;  %s32_s9 = int_to_ptr.vmem [resolvable:$true] %s31_s9 }
  0x17   :  { %s2260_s15 = smov 8   ;;  %s55_s0 = sshll.u32 %s2410_s2, 4  ;;  %s56_s0 = int_to_ptr.hbm [resolvable:$true] %s55_s0 }
  0x18   :  { %37 = dma.hbm_to_vmem [thread:$0]  %s30_s28, 256, %s32_s9, [#allocation3], %s2259_s14, %s2259_s14, %s2260_s15  }
  0x19   :  { %s2261_s19 = smov [#allocation7]   ;;  %s81_s22 = sshll.u32 %s2412_s4, 4  ;;  %s82_s22 = int_to_ptr.hbm [resolvable:$true] %s81_s22 }
  0x1a   :  { %s57_s20 = sshll.u32 %s2261_s19, 4  ;;  %s2262_s5 = smov [#allocation10]   ;;  %s58_s20 = int_to_ptr.vmem [resolvable:$true] %s57_s20 }
  0x1b   :  { %63 = dma.hbm_to_vmem [thread:$0]  %s56_s0, 1024, %s58_s20, [#allocation6], %s2253_s1, %s2253_s1, %s2254_s18  }
  0x1c   :  { %s83_s23 = sshll.u32 %s2262_s5, 4  ;;  %s107_s26 = sshll.u32 %s2414_s6, 4  ;;  %s84_s23 = int_to_ptr.vmem [resolvable:$true] %s83_s23  ;;  %s108_s26 = int_to_ptr.hbm [resolvable:$true] %s107_s26 }
  0x1d   :  { %89 = dma.hbm_to_vmem [thread:$0]  %s82_s22, 1024, %s84_s23, [#allocation9], %s2253_s1, %s2253_s1, %s2254_s18  }
  0x1e   :  { %s133_s4 = sshll.u32 %s2416_s8, 4  ;;  %s2263_s27 = smov [#allocation13]   ;;  %s134_s4 = int_to_ptr.hbm [resolvable:$true] %s133_s4 }
  0x1f   :  { %s109_s28 = sshll.u32 %s2263_s27, 4  ;;  %s2264_s29 = smov [#allocation16]   ;;  %s110_s28 = int_to_ptr.vmem [resolvable:$true] %s109_s28 }
  0x20   :  { %115 = dma.hbm_to_vmem [thread:$0]  %s108_s26, 2048, %s110_s28, [#allocation12], %s2259_s14, %s2259_s14, %s2260_s15  }
  0x21   :  { %s135_s6 = sshll.u32 %s2264_s29, 4  ;;  %s159_s9 = sshll.u32 %s2418_s10, 4  ;;  %s136_s6 = int_to_ptr.vmem [resolvable:$true] %s135_s6  ;;  %s160_s9 = int_to_ptr.hbm [resolvable:$true] %s159_s9 }
  0x22   :  { %141 = dma.hbm_to_vmem [thread:$0]  %s134_s4, 2048, %s136_s6, [#allocation15], %s2259_s14, %s2259_s14, %s2260_s15  }
  0x23   :  { %s172_s17 = sshll.u32 %s2419_s11, 4  ;;  %s2265_s0 = smov [#allocation19]   ;;  %s173_s17 = int_to_ptr.hbm [resolvable:$true] %s172_s17 }
  0x24   :  { %s161_s19 = sshll.u32 %s2265_s0, 4  ;;  %s2266_s20 = smov [#allocation20]   ;;  %s162_s19 = int_to_ptr.vmem [resolvable:$true] %s161_s19 }
  0x25   :  { %167 = dma.hbm_to_vmem [thread:$0]  %s160_s9, 1024, %s162_s19, [#allocation18], %s2253_s1, %s2253_s1, %s2254_s18  }
  0x26   :  { %s174_s10 = sshll.u32 %s2266_s20, 4  ;;  %s175_s10 = int_to_ptr.vmem [resolvable:$true] %s174_s10 }
  0x27   :  { %180 = dma.hbm_to_vmem [thread:$0]  %s173_s17, 1024, %s175_s10, [#allocation21], %s2253_s1, %s2253_s1, %s2254_s18  }
  0x28   :  { %2233 = dma.done.wait [#allocation3], 256  }
  0x29   :  { %2234 = vsyncadd [#allocation3], 4294967040 }
  0x2a   :  { %2235 = dma.done.wait [#allocation6], 1536  }
  0x2b   :  { %2236 = vsyncadd [#allocation6], 4294965760 }
  0x2c   :  { %2237 = dma.done.wait [#allocation9], 2048  }
  0x2d   :  { %2238 = vsyncadd [#allocation9], 4294965248 }
  0x2e   :  { %2239 = dma.done.wait [#allocation12], 3072  }
  0x2f   :  { %2240 = vsyncadd [#allocation12], 4294964224 }
  0x30   :  { %2241 = dma.done.wait [#allocation15], 4096  }
  0x31   :  { %2242 = vsyncadd [#allocation15], 4294963200 }
  0x32   :  { %2243 = dma.done.wait [#allocation18], 3072  }
  0x33   :  { %2244 = vsyncadd [#allocation18], 4294964224 }
  0x34   :  { %2245 = dma.done.wait [#allocation21], 1024  }
  0x35   :  { %2246 = vsyncadd [#allocation21], 4294966272  ;;  %v1797_v0 = vld [vmem:[#allocation7 + $0x38] sm:$0xff]  ;;  %v1796_v1 = vld [vmem:[#allocation7 + $0x30] sm:$0xff]  ;;  %s2267_s11 = smov [#allocation22]   ;;  %s1323_s3 = sshll.u32 %s2420_s12, 4  ;;  %s1324_s3 = int_to_ptr.hbm [resolvable:$true] %s1323_s3 }
  0x36   :  { %297 = vmatpush.bf16.msra.mxu0 %v1797_v0  ;;  %v1805_v2 = vld [vmem:[#allocation8 + $0x38] sm:$0xff]  ;;  %v1804_v3 = vld [vmem:[#allocation8 + $0x30] sm:$0xff]  ;;  %v1795_v4 = vld [vmem:[#allocation7 + $0x28] sm:$0xff]  ;;  %s1321_s1 = sshll.u32 %s2267_s11, 4  ;;  %s1322_s1 = int_to_ptr.vmem [resolvable:$true] %s1321_s1 }
  0x37   :  { %379 = vmatpush.bf16.msra.mxu1 %v1805_v2  ;;  %v1803_v5 = vld [vmem:[#allocation8 + $0x28] sm:$0xff]  ;;  %v1794_v6 = vld [vmem:[#allocation7 + $0x20] sm:$0xff]  ;;  %v1793_v8 = vld [vmem:[#allocation7 + $0x18] sm:$0xff] }
  0x38   :  { %v1802_v7 = vld [vmem:[#allocation8 + $0x20] sm:$0xff]  ;;  %v1792_v9 = vld [vmem:[#allocation7 + $0x10] sm:$0xff]  ;;  %v1791_v10 = vld [vmem:[#allocation7 + $0x8] sm:$0xff] }
  0x39   :  { %v1790_v11 = vld [vmem:[#allocation7] sm:$0xff]  ;;  %v229_v12 = vld [vmem:[#allocation2] sm:$0xff]  ;;  %v230_v13 = vld [vmem:[#allocation2 + $0x8] sm:$0xff] }
  0x3a   :  { %298 = vmatpush.bf16.msra.mxu0 %v1796_v1  ;;  %v248_v14 = vpack.c.bf16 %v230_v13, %v229_v12  ;;  %v1801_v15 = vld [vmem:[#allocation8 + $0x18] sm:$0xff]  ;;  %v1800_v16 = vld [vmem:[#allocation8 + $0x10] sm:$0xff]  ;;  %v1799_v17 = vld [vmem:[#allocation8 + $0x8] sm:$0xff] }
  0x3b   :  { %380 = vmatpush.bf16.msra.mxu1 %v1804_v3  ;;  %v1798_v18 = vld [vmem:[#allocation8] sm:$0xff]  ;;  %v1813_v19 = vld [vmem:[#allocation10 + $0x38] sm:$0xff]  ;;  %v1812_v20 = vld [vmem:[#allocation10 + $0x30] sm:$0xff] }
  0x3c   :  { %461 = vmatpush.bf16.msra.mxu2 %v1813_v19  ;;  %v1811_v21 = vld [vmem:[#allocation10 + $0x28] sm:$0xff]  ;;  %v1810_v22 = vld [vmem:[#allocation10 + $0x20] sm:$0xff]  ;;  %v1809_v31 = vld [vmem:[#allocation10 + $0x18] sm:$0xff] }
  0x3d   :  { %v247_v24 = vld [vmem:[#allocation5] ss:$0 sm:$0xff]  ;;  %v1808_v32 = vld [vmem:[#allocation10 + $0x10] sm:$0xff]  ;;  %v1807_v33 = vld [vmem:[#allocation10 + $0x8] sm:$0xff] }
  0x3e   :  { %299 = vmatpush.bf16.msra.mxu0 %v1795_v4  ;;  %v1806_v34 = vld [vmem:[#allocation10] sm:$0xff]  ;;  %v1821_v35 = vld [vmem:[#allocation11 + $0x38] sm:$0xff]  ;;  %v1820_v36 = vld [vmem:[#allocation11 + $0x30] sm:$0xff] }
  0x3f   :  { %381 = vmatpush.bf16.msra.mxu1 %v1803_v5  ;;  %543 = vmatpush.bf16.msra.mxu3 %v1821_v35  ;;  %v1819_v37 = vld [vmem:[#allocation11 + $0x28] sm:$0xff]  ;;  %v1818_v38 = vld [vmem:[#allocation11 + $0x20] sm:$0xff]  ;;  %v1817_v47 = vld [vmem:[#allocation11 + $0x18] sm:$0xff] }
  0x40   :  { %462 = vmatpush.bf16.msra.mxu2 %v1812_v20  ;;  %v329_v40 = vld [vmem:[#allocation5 + $0x1] ss:$0 sm:$0xff]  ;;  %v1816_v48 = vld [vmem:[#allocation11 + $0x10] sm:$0xff]  ;;  %v1815_v49 = vld [vmem:[#allocation11 + $0x8] sm:$0xff] }
  0x41   :  { %v1814_v50 = vld [vmem:[#allocation11] sm:$0xff]  ;;  %v1528_v51 = vld [vmem:[#allocation13 + $0x70] sm:$0xf]  ;;  %v1837_v52 = vld [vmem:[#allocation13 + $0x74] sm:$0xf0] }
  0x42   :  { %300 = vmatpush.bf16.msra.mxu0 %v1794_v6  ;;  %v1836_v53 = vld [vmem:[#allocation13 + $0x74] sm:$0xf]  ;;  %v1529_v54 = vor.u32 %v1837_v52, %v1528_v51  ;;  %v1530_v55 = vld [vmem:[#allocation13 + $0x78] sm:$0xf0]  ;;  %v1520_v56 = vld [vmem:[#allocation13 + $0x60] sm:$0xf] }
  0x43   :  { %382 = vmatpush.bf16.msra.mxu1 %v1802_v7  ;;  %544 = vmatpush.bf16.msra.mxu3 %v1820_v36  ;;  %v1835_v57 = vld [vmem:[#allocation13 + $0x64] sm:$0xf0]  ;;  %v1533_v58 = vor.u32 %v1836_v53, %v1530_v55  ;;  %v1834_v59 = vld [vmem:[#allocation13 + $0x64] sm:$0xf]  ;;  %v1522_v60 = vld [vmem:[#allocation13 + $0x68] sm:$0xf0] }
  0x44   :  { %463 = vmatpush.bf16.msra.mxu2 %v1811_v21  ;;  %v1521_v61 = vor.u32 %v1835_v57, %v1520_v56  ;;  %v1525_v62 = vor.u32 %v1834_v59, %v1522_v60  ;;  %v1512_v63 = vld [vmem:[#allocation13 + $0x50] sm:$0xf]  ;;  %v1833_v0 = vld [vmem:[#allocation13 + $0x54] sm:$0xf0]  ;;  %v1832_v1 = vld [vmem:[#allocation13 + $0x54] sm:$0xf] }
  0x45   :  { %v1514_v2 = vld [vmem:[#allocation13 + $0x58] sm:$0xf0]  ;;  %v1513_v3 = vor.u32 %v1833_v0, %v1512_v63  ;;  %v1504_v5 = vld [vmem:[#allocation13 + $0x40] sm:$0xf]  ;;  %v1831_v6 = vld [vmem:[#allocation13 + $0x44] sm:$0xf0] }
  0x46   :  { %301 = vmatpush.bf16.msra.mxu0 %v1793_v8  ;;  %v1517_v4 = vor.u32 %v1832_v1, %v1514_v2  ;;  %v1830_v7 = vld [vmem:[#allocation13 + $0x44] sm:$0xf]  ;;  %v1506_v8 = vld [vmem:[#allocation13 + $0x48] sm:$0xf0]  ;;  %v411_v12 = vld [vmem:[#allocation5 + $0x2] ss:$0 sm:$0xff] }
  0x47   :  { %383 = vmatpush.bf16.msra.mxu1 %v1801_v15  ;;  %545 = vmatpush.bf16.msra.mxu3 %v1819_v37  ;;  %v1496_v19 = vld [vmem:[#allocation13 + $0x30] sm:$0xf]  ;;  %v1829_v20 = vld [vmem:[#allocation13 + $0x34] sm:$0xf0]  ;;  %v1828_v21 = vld [vmem:[#allocation13 + $0x34] sm:$0xf] }
  0x48   :  { %464 = vmatpush.bf16.msra.mxu2 %v1810_v22  ;;  %v1497_v22 = vor.u32 %v1829_v20, %v1496_v19  ;;  %v1482_v35 = vld [vmem:[#allocation13 + $0x18] sm:$0xf0]  ;;  %v1472_v37 = vld [vmem:[#allocation13] sm:$0xf]  ;;  %v1839_v63 = vld [vmem:[#allocation14 + $0x8] sm:$0xff] }
  0x49   :  { %v493_v52 = vld [vmem:[#allocation5 + $0x3] ss:$0 sm:$0xff]  ;;  %v1841_v59 = vld [vmem:[#allocation14 + $0x18] sm:$0xff]  ;;  %v1847_v0 = vld [vmem:[#allocation14 + $0x48] sm:$0xff] }
  0x4a   :  { %302 = vmatpush.bf16.msra.mxu0 %v1792_v9  ;;  %v1505_v9 = vor.u32 %v1831_v6, %v1504_v5  ;;  %v1849_v60 = vld [vmem:[#allocation14 + $0x58] sm:$0xff]  ;;  %v1838_v1 = vld [vmem:[#allocation14] sm:$0xff]  ;;  %v1868_v5 = vld [vmem:[#allocation16 + $0x74] sm:$0xf] }
  0x4b   :  { %384 = vmatpush.bf16.msra.mxu1 %v1800_v16  ;;  %546 = vmatpush.bf16.msra.mxu3 %v1818_v38  ;;  %v1823_v38 = vld [vmem:[#allocation13 + $0x4] sm:$0xf0]  ;;  %v1846_v2 = vld [vmem:[#allocation14 + $0x40] sm:$0xff] }
  0x4c   :  { %465 = vmatpush.bf16.msra.mxu2 %v1809_v31  ;;  %v1480_v31 = vld [vmem:[#allocation13 + $0x10] sm:$0xf] }
  0x4e   :  { %303 = vmatpush.bf16.msra.mxu0 %v1791_v10  ;;  %v1509_v10 = vor.u32 %v1830_v7, %v1506_v8  ;;  %v1658_v7 = vld [vmem:[#allocation16 + $0x78] sm:$0xf0]  ;;  %v1648_v8 = vld [vmem:[#allocation16 + $0x60] sm:$0xf] }
  0x4f   :  { %385 = vmatpush.bf16.msra.mxu1 %v1799_v17  ;;  %547 = vmatpush.bf16.msra.mxu3 %v1817_v47  ;;  %v1843_v47 = vld [vmem:[#allocation14 + $0x28] sm:$0xff] }
  0x50   :  { %466 = vmatpush.bf16.msra.mxu2 %v1808_v32  ;;  %v1825_v32 = vld [vmem:[#allocation13 + $0x14] sm:$0xf0] }
  0x52   :  { %304 = vmatpush.bf16.msra.mxu0 %v1790_v11 }
  0x53   :  { %386 = vmatpush.bf16.msra.mxu1 %v1798_v18  ;;  %548 = vmatpush.bf16.msra.mxu3 %v1816_v48  ;;  %v1851_v48 = vld [vmem:[#allocation14 + $0x68] sm:$0xff] }
  0x54   :  { %467 = vmatpush.bf16.msra.mxu2 %v1807_v33  ;;  %v1824_v33 = vld [vmem:[#allocation13 + $0x14] sm:$0xf] }
  0x55   :  { %305 = vmatmul.bf16.vlgmr.msra.gmra.mxu0 %v248_v14  ;;  %v1485_v36 = vor.u32 %v1824_v33, %v1482_v35 }
  0x56   :  { %663 = vmatpush.bf16.msrb.mxu0 %v1529_v54 }
  0x57   :  { %549 = vmatpush.bf16.msra.mxu3 %v1815_v49  ;;  %677 = vmatpush.bf16.msrb.mxu1 %v1533_v58  ;;  %v1842_v49 = vld [vmem:[#allocation14 + $0x20] sm:$0xff] }
  0x58   :  { %468 = vmatpush.bf16.msra.mxu2 %v1806_v34  ;;  %v1481_v34 = vor.u32 %v1825_v32, %v1480_v31 }
  0x5a   :  { %664 = vmatpush.bf16.msrb.mxu0 %v1521_v61  ;;  %v1840_v61 = vld [vmem:[#allocation14 + $0x10] sm:$0xff] }
  0x5b   :  { %550 = vmatpush.bf16.msra.mxu3 %v1814_v50  ;;  %678 = vmatpush.bf16.msrb.mxu1 %v1525_v62  ;;  %v1850_v50 = vld [vmem:[#allocation14 + $0x60] sm:$0xff]  ;;  %v1848_v62 = vld [vmem:[#allocation14 + $0x50] sm:$0xff] }
  0x5e   :  { %665 = vmatpush.bf16.msrb.mxu0 %v1513_v3  ;;  %v1656_v3 = vld [vmem:[#allocation16 + $0x70] sm:$0xf] }
  0x5f   :  { %679 = vmatpush.bf16.msrb.mxu1 %v1517_v4  ;;  %v1869_v4 = vld [vmem:[#allocation16 + $0x74] sm:$0xf0] }
  0x60   :  { %v1657_v6 = vor.u32 %v1869_v4, %v1656_v3  ;;  %v1877_v4 = vld [vmem:[#allocation17 + $0x38] sm:$0xff] }
  0x62   :  { %666 = vmatpush.bf16.msrb.mxu0 %v1505_v9  ;;  %v1867_v9 = vld [vmem:[#allocation16 + $0x64] sm:$0xf0] }
  0x63   :  { %680 = vmatpush.bf16.msrb.mxu1 %v1509_v10  ;;  %v1661_v10 = vor.u32 %v1868_v5, %v1658_v7  ;;  %v1885_v5 = vld [vmem:[#allocation17 + $0x78] sm:$0xff]  ;;  %v1884_v7 = vld [vmem:[#allocation17 + $0x70] sm:$0xff] }
  0x66   :  { %667 = vmatpush.bf16.msrb.mxu0 %v1497_v22  ;;  %v1863_v22 = vld [vmem:[#allocation16 + $0x44] sm:$0xf0] }
  0xd2   :  { %v306_v23 = vpop.f32.mrf.mxu0 }
  0xd3   :  { %v307_v25 = vadd.f32 %v306_v23, %v247_v24  ;;  %v1498_v23 = vld [vmem:[#allocation13 + $0x38] sm:$0xf0] }
  0xd5   :  { %v311_v28 = vmax.f32 %v307_v25, 0.0  ;;  %v1488_v25 = vld [vmem:[#allocation13 + $0x20] sm:$0xf] }
  0xda   :  { %v308_v26 = vpop.f32.mrf.mxu0 }
  0xdb   :  { %v309_v27 = vadd.f32 %v308_v26, %v247_v24  ;;  %v1501_v24 = vor.u32 %v1828_v21, %v1498_v23  ;;  %v1827_v26 = vld [vmem:[#allocation13 + $0x24] sm:$0xf0]  ;;  %v1632_v21 = vld [vmem:[#allocation16 + $0x40] sm:$0xf]  ;;  %v1862_v23 = vld [vmem:[#allocation16 + $0x44] sm:$0xf] }
  0xdd   :  { %v312_v29 = vmax.f32 %v309_v27, 0.0  ;;  %681 = vmatpush.bf16.msrb.mxu1 %v1501_v24  ;;  %v1826_v27 = vld [vmem:[#allocation13 + $0x24] sm:$0xf]  ;;  %v1634_v24 = vld [vmem:[#allocation16 + $0x48] sm:$0xf0] }
  0xdf   :  { %v330_v30 = vpack.c.bf16 %v312_v29, %v311_v28  ;;  %v1489_v28 = vor.u32 %v1827_v26, %v1488_v25  ;;  %v1490_v29 = vld [vmem:[#allocation13 + $0x28] sm:$0xf0]  ;;  %v1633_v25 = vor.u32 %v1863_v22, %v1632_v21  ;;  %v1637_v26 = vor.u32 %v1862_v23, %v1634_v24  ;;  %v1873_v24 = vld [vmem:[#allocation17 + $0x18] sm:$0xff] }
  0xe1   :  { %387 = vmatmul.bf16.vlgmr.msra.gmra.mxu1 %v330_v30  ;;  %v1493_v30 = vor.u32 %v1826_v27, %v1490_v29  ;;  %668 = vmatpush.bf16.msrb.mxu0 %v1489_v28  ;;  %v576_v27 = vld [vmem:[#allocation5 + $0x4] ss:$8 sm:$0x3] }
  0xe2   :  { %v580_v31 = vperm.slane %v576_v27, 1 }
  0xe3   :  { %682 = vmatpush.bf16.msrb.mxu1 %v1493_v30  ;;  %v579_v30 = vperm.slane %v576_v27, 0  ;;  %v1880_v27 = vld [vmem:[#allocation17 + $0x50] sm:$0xff] }
  0xe5   :  { %669 = vmatpush.bf16.msrb.mxu0 %v1481_v34 }
  0xe7   :  { %683 = vmatpush.bf16.msrb.mxu1 %v1485_v36 }
 0x15e   :  { %v388_v39 = vpop.f32.mrf.mxu1 }
 0x15f   :  { %v389_v41 = vadd.f32 %v388_v39, %v329_v40  ;;  %v1822_v39 = vld [vmem:[#allocation13 + $0x4] sm:$0xf] }
 0x161   :  { %v393_v44 = vmax.f32 %v389_v41, 0.0  ;;  %v1474_v41 = vld [vmem:[#allocation13 + $0x8] sm:$0xf0] }
 0x166   :  { %v390_v42 = vpop.f32.mrf.mxu1 }
 0x167   :  { %v391_v43 = vadd.f32 %v390_v42, %v329_v40  ;;  %v1473_v40 = vor.u32 %v1823_v38, %v1472_v37  ;;  %v1477_v42 = vor.u32 %v1822_v39, %v1474_v41 }
 0x169   :  { %v394_v45 = vmax.f32 %v391_v43, 0.0  ;;  %670 = vmatpush.bf16.msrb.mxu0 %v1473_v40  ;;  %684 = vmatpush.bf16.msrb.mxu1 %v1477_v42  ;;  %v1845_v43 = vld [vmem:[#allocation14 + $0x38] sm:$0xff] }
 0x16a   :  { %826 = vmatpush.bf16.msrb.mxu2 %v1845_v43 }
 0x16b   :  { %v412_v46 = vpack.c.bf16 %v394_v45, %v393_v44  ;;  %v1853_v44 = vld [vmem:[#allocation14 + $0x78] sm:$0xff]  ;;  %v1844_v45 = vld [vmem:[#allocation14 + $0x30] sm:$0xff] }
 0x16c   :  { %840 = vmatpush.bf16.msrb.mxu3 %v1853_v44  ;;  %v1624_v44 = vld [vmem:[#allocation16 + $0x30] sm:$0xf] }
 0x16d   :  { %469 = vmatmul.bf16.vlgmr.msra.gmra.mxu2 %v412_v46  ;;  %v1852_v46 = vld [vmem:[#allocation14 + $0x70] sm:$0xff]  ;;  %960 = vmatpush.bf16.msra.mxu0 %v1657_v6 }
 0x16e   :  { %827 = vmatpush.bf16.msrb.mxu2 %v1844_v45  ;;  %974 = vmatpush.bf16.msra.mxu1 %v1661_v10  ;;  %v1861_v45 = vld [vmem:[#allocation16 + $0x34] sm:$0xf0]  ;;  %v1876_v6 = vld [vmem:[#allocation17 + $0x30] sm:$0xff]  ;;  %v1874_v10 = vld [vmem:[#allocation17 + $0x20] sm:$0xff] }
 0x170   :  { %841 = vmatpush.bf16.msrb.mxu3 %v1852_v46  ;;  %v1860_v46 = vld [vmem:[#allocation16 + $0x34] sm:$0xf] }
 0x172   :  { %828 = vmatpush.bf16.msrb.mxu2 %v1843_v47  ;;  %v1625_v47 = vor.u32 %v1861_v45, %v1624_v44 }
 0x174   :  { %842 = vmatpush.bf16.msrb.mxu3 %v1851_v48  ;;  %v1626_v48 = vld [vmem:[#allocation16 + $0x38] sm:$0xf0] }
 0x176   :  { %829 = vmatpush.bf16.msrb.mxu2 %v1842_v49  ;;  %v1629_v49 = vor.u32 %v1860_v46, %v1626_v48 }
 0x178   :  { %843 = vmatpush.bf16.msrb.mxu3 %v1850_v50  ;;  %v1616_v50 = vld [vmem:[#allocation16 + $0x20] sm:$0xf] }
 0x17a   :  { %830 = vmatpush.bf16.msrb.mxu2 %v1841_v59 }
 0x17c   :  { %844 = vmatpush.bf16.msrb.mxu3 %v1849_v60  ;;  %v1610_v60 = vld [vmem:[#allocation16 + $0x18] sm:$0xf0] }
 0x17e   :  { %831 = vmatpush.bf16.msrb.mxu2 %v1840_v61 }
 0x180   :  { %845 = vmatpush.bf16.msrb.mxu3 %v1848_v62  ;;  %v1600_v62 = vld [vmem:[#allocation16] sm:$0xf] }
 0x182   :  { %832 = vmatpush.bf16.msrb.mxu2 %v1839_v63  ;;  %v1855_v63 = vld [vmem:[#allocation16 + $0x4] sm:$0xf0] }
 0x184   :  { %846 = vmatpush.bf16.msrb.mxu3 %v1847_v0  ;;  %v1854_v0 = vld [vmem:[#allocation16 + $0x4] sm:$0xf] }
 0x186   :  { %833 = vmatpush.bf16.msrb.mxu2 %v1838_v1  ;;  %v1601_v1 = vor.u32 %v1855_v63, %v1600_v62  ;;  %v1024_v63 = vld [vmem:[#allocation5 + $0x7] ss:$0 sm:$0xff] }
 0x188   :  { %847 = vmatpush.bf16.msrb.mxu3 %v1846_v2  ;;  %v1602_v2 = vld [vmem:[#allocation16 + $0x8] sm:$0xf0] }
 0x189   :  { %v1605_v3 = vor.u32 %v1854_v0, %v1602_v2 }
 0x18a   :  { %1123 = vmatpush.bf16.msra.mxu2 %v1877_v4 }
 0x18e   :  { %1124 = vmatpush.bf16.msra.mxu2 %v1876_v6 }
 0x1f0   :  { %v470_v11 = vpop.f32.mrf.mxu2 }
 0x1f1   :  { %v471_v13 = vadd.f32 %v470_v11, %v411_v12  ;;  %v1866_v11 = vld [vmem:[#allocation16 + $0x64] sm:$0xf] }
 0x1f3   :  { %v475_v16 = vmax.f32 %v471_v13, 0.0  ;;  %v1649_v13 = vor.u32 %v1867_v9, %v1648_v8  ;;  %v1875_v8 = vld [vmem:[#allocation17 + $0x28] sm:$0xff] }
 0x1f4   :  { %v1883_v9 = vld [vmem:[#allocation17 + $0x68] sm:$0xff]  ;;  %1125 = vmatpush.bf16.msra.mxu2 %v1875_v8 }
 0x1f5   :  { %961 = vmatpush.bf16.msra.mxu0 %v1649_v13 }
 0x1f8   :  { %v472_v14 = vpop.f32.mrf.mxu2  ;;  %1126 = vmatpush.bf16.msra.mxu2 %v1874_v10  ;;  %v1896_v10 = vld [vmem:[#allocation20 + $0x10] sm:$0xff] }
 0x1f9   :  { %v473_v15 = vadd.f32 %v472_v14, %v411_v12  ;;  %v1650_v12 = vld [vmem:[#allocation16 + $0x68] sm:$0xf0] }
 0x1fa   :  { %v1653_v14 = vor.u32 %v1866_v11, %v1650_v12  ;;  %v1882_v11 = vld [vmem:[#allocation17 + $0x60] sm:$0xff] }
 0x1fb   :  { %v476_v17 = vmax.f32 %v473_v15, 0.0  ;;  %v1640_v15 = vld [vmem:[#allocation16 + $0x50] sm:$0xf] }
 0x1fc   :  { %975 = vmatpush.bf16.msra.mxu1 %v1653_v14  ;;  %v727_v14 = vld [vmem:[#allocation5 + $0x5] ss:$0 sm:$0xff]  ;;  %1127 = vmatpush.bf16.msra.mxu2 %v1873_v24 }
 0x1fd   :  { %v494_v18 = vpack.c.bf16 %v476_v17, %v475_v16  ;;  %v1865_v16 = vld [vmem:[#allocation16 + $0x54] sm:$0xf0]  ;;  %v1864_v17 = vld [vmem:[#allocation16 + $0x54] sm:$0xf] }
 0x1fe   :  { %v1641_v19 = vor.u32 %v1865_v16, %v1640_v15 }
 0x1ff   :  { %551 = vmatmul.bf16.vlgmr.msra.gmra.mxu3 %v494_v18  ;;  %v1642_v18 = vld [vmem:[#allocation16 + $0x58] sm:$0xf0] }
 0x200   :  { %v1645_v20 = vor.u32 %v1864_v17, %v1642_v18  ;;  %962 = vmatpush.bf16.msra.mxu0 %v1641_v19  ;;  %1137 = vmatpush.bf16.msra.mxu3 %v1885_v5 }
 0x202   :  { %976 = vmatpush.bf16.msra.mxu1 %v1645_v20 }
 0x204   :  { %963 = vmatpush.bf16.msra.mxu0 %v1633_v25  ;;  %1138 = vmatpush.bf16.msra.mxu3 %v1884_v7  ;;  %v1881_v25 = vld [vmem:[#allocation17 + $0x58] sm:$0xff] }
 0x206   :  { %977 = vmatpush.bf16.msra.mxu1 %v1637_v26  ;;  %v1872_v26 = vld [vmem:[#allocation17 + $0x10] sm:$0xff] }
 0x207   :  { %1128 = vmatpush.bf16.msra.mxu2 %v1872_v26 }
 0x208   :  { %964 = vmatpush.bf16.msra.mxu0 %v1625_v47  ;;  %1139 = vmatpush.bf16.msra.mxu3 %v1883_v9  ;;  %v1897_v9 = vld [vmem:[#allocation20 + $0x18] sm:$0xff] }
 0x20a   :  { %978 = vmatpush.bf16.msra.mxu1 %v1629_v49 }
 0x20c   :  { %1140 = vmatpush.bf16.msra.mxu3 %v1882_v11  ;;  %v1895_v11 = vld [vmem:[#allocation20 + $0x8] sm:$0xff] }
 0x210   :  { %1141 = vmatpush.bf16.msra.mxu3 %v1881_v25 }
 0x214   :  { %1142 = vmatpush.bf16.msra.mxu3 %v1880_v27 }
 0x282   :  { %v552_v51 = vpop.f32.mrf.mxu3 }
 0x283   :  { %v553_v53 = vadd.f32 %v552_v51, %v493_v52  ;;  %v1859_v51 = vld [vmem:[#allocation16 + $0x24] sm:$0xf0] }
 0x285   :  { %v557_v56 = vmax.f32 %v553_v53, 0.0  ;;  %v1617_v53 = vor.u32 %v1859_v51, %v1616_v50 }
 0x287   :  { %965 = vmatpush.bf16.msra.mxu0 %v1617_v53  ;;  %v1889_v53 = vld [vmem:[#allocation19 + $0x18] sm:$0xff] }
 0x28a   :  { %v554_v54 = vpop.f32.mrf.mxu3 }
 0x28b   :  { %v555_v55 = vadd.f32 %v554_v54, %v493_v52  ;;  %v1858_v52 = vld [vmem:[#allocation16 + $0x24] sm:$0xf]  ;;  %v1618_v54 = vld [vmem:[#allocation16 + $0x28] sm:$0xf0] }
 0x28d   :  { %v558_v57 = vmax.f32 %v555_v55, 0.0  ;;  %v1621_v55 = vor.u32 %v1858_v52, %v1618_v54  ;;  %v1888_v54 = vld [vmem:[#allocation19 + $0x10] sm:$0xff] }
 0x28f   :  { %v577_v58 = vpack.c.bf16 %v558_v57, %v557_v56  ;;  %979 = vmatpush.bf16.msra.mxu1 %v1621_v55  ;;  %v1608_v56 = vld [vmem:[#allocation16 + $0x10] sm:$0xf]  ;;  %v1857_v57 = vld [vmem:[#allocation16 + $0x14] sm:$0xf0]  ;;  %v1887_v55 = vld [vmem:[#allocation19 + $0x8] sm:$0xff] }
 0x290   :  { %v1609_v59 = vor.u32 %v1857_v57, %v1608_v56  ;;  %v1886_v56 = vld [vmem:[#allocation19] sm:$0xff]  ;;  %v1901_v57 = vld [vmem:[#allocation20 + $0x38] sm:$0xff] }
 0x291   :  { %671 = vmatmul.bf16.vlgmr.msrb.gmra.mxu0 %v577_v58  ;;  %685 = vmatmul.bf16.vlgmr.msrb.gmra.mxu1 %v577_v58  ;;  %v1856_v58 = vld [vmem:[#allocation16 + $0x14] sm:$0xf] }
 0x292   :  { %v1613_v61 = vor.u32 %v1856_v58, %v1610_v60  ;;  %966 = vmatpush.bf16.msra.mxu0 %v1609_v59  ;;  %v1900_v58 = vld [vmem:[#allocation20 + $0x30] sm:$0xff]  ;;  %v1899_v59 = vld [vmem:[#allocation20 + $0x28] sm:$0xff]  ;;  %v1898_v60 = vld [vmem:[#allocation20 + $0x20] sm:$0xff] }
 0x294   :  { %980 = vmatpush.bf16.msra.mxu1 %v1613_v61 }
 0x296   :  { %967 = vmatpush.bf16.msra.mxu0 %v1601_v1 }
 0x298   :  { %981 = vmatpush.bf16.msra.mxu1 %v1605_v3 }
 0x29c   :  { %1301 = vmatpush.bf16.msrb.mxu1 %v1901_v57 }
 0x2a0   :  { %1302 = vmatpush.bf16.msrb.mxu1 %v1900_v58 }
 0x2a4   :  { %1303 = vmatpush.bf16.msrb.mxu1 %v1899_v59 }
 0x2a8   :  { %1304 = vmatpush.bf16.msrb.mxu1 %v1898_v60 }
 0x2ac   :  { %1305 = vmatpush.bf16.msrb.mxu1 %v1897_v9 }
 0x2b0   :  { %1306 = vmatpush.bf16.msrb.mxu1 %v1896_v10 }
 0x2b4   :  { %1307 = vmatpush.bf16.msrb.mxu1 %v1895_v11 }
 0x30e   :  { %v672_v28 = vpop.f32.mrf.mxu0  ;;  %v686_v29 = vpop.f32.mrf.mxu1 }
 0x30f   :  { %v673_v32 = vadd.f32 %v672_v28, %v579_v30  ;;  %v687_v33 = vadd.f32 %v686_v29, %v580_v31  ;;  %v1871_v28 = vld [vmem:[#allocation17 + $0x8] sm:$0xff] }
 0x310   :  { %v1879_v29 = vld [vmem:[#allocation17 + $0x48] sm:$0xff]  ;;  %1129 = vmatpush.bf16.msra.mxu2 %v1871_v28 }
 0x311   :  { %v691_v38 = vmax.f32 %v673_v32, 0.0  ;;  %v692_v39 = vmax.f32 %v687_v33, 0.0  ;;  %1143 = vmatpush.bf16.msra.mxu3 %v1879_v29  ;;  %v1893_v32 = vld [vmem:[#allocation19 + $0x38] sm:$0xff]  ;;  %v1892_v33 = vld [vmem:[#allocation19 + $0x30] sm:$0xff] }
 0x312   :  { %1219 = vmatpush.bf16.msrb.mxu0 %v1893_v32 }
 0x316   :  { %v674_v34 = vpop.f32.mrf.mxu0  ;;  %v688_v35 = vpop.f32.mrf.mxu1  ;;  %1220 = vmatpush.bf16.msrb.mxu0 %v1892_v33 }
 0x317   :  { %v675_v36 = vadd.f32 %v674_v34, %v579_v30  ;;  %v689_v37 = vadd.f32 %v688_v35, %v580_v31  ;;  %v1870_v30 = vld [vmem:[#allocation17] sm:$0xff]  ;;  %v1891_v34 = vld [vmem:[#allocation19 + $0x28] sm:$0xff] }
 0x318   :  { %v1878_v31 = vld [vmem:[#allocation17 + $0x40] sm:$0xff]  ;;  %1130 = vmatpush.bf16.msra.mxu2 %v1870_v30 }
 0x319   :  { %v693_v40 = vmax.f32 %v675_v36, 0.0  ;;  %v694_v41 = vmax.f32 %v689_v37, 0.0  ;;  %1144 = vmatpush.bf16.msra.mxu3 %v1878_v31  ;;  %v1890_v35 = vld [vmem:[#allocation19 + $0x20] sm:$0xff] }
 0x31a   :  { %1221 = vmatpush.bf16.msrb.mxu0 %v1891_v34  ;;  %v873_v36 = vld [vmem:[#allocation5 + $0x6] ss:$8 sm:$0x3] }
 0x31b   :  { %v728_v42 = vpack.c.bf16 %v693_v40, %v691_v38  ;;  %v729_v43 = vpack.c.bf16 %v694_v41, %v692_v39  ;;  %v876_v39 = vperm.slane %v873_v36, 0  ;;  %v877_v40 = vperm.slane %v873_v36, 1 }
 0x31d   :  { %834 = vmatmul.bf16.vlgmr.msrb.gmra.mxu2 %v728_v42  ;;  %848 = vmatmul.bf16.vlgmr.msrb.gmra.mxu3 %v729_v43 }
 0x31e   :  { %1222 = vmatpush.bf16.msrb.mxu0 %v1890_v35 }
 0x322   :  { %1223 = vmatpush.bf16.msrb.mxu0 %v1889_v53 }
 0x326   :  { %1224 = vmatpush.bf16.msrb.mxu0 %v1888_v54 }
 0x32a   :  { %1225 = vmatpush.bf16.msrb.mxu0 %v1887_v55 }
 0x32e   :  { %1226 = vmatpush.bf16.msrb.mxu0 %v1886_v56 }
 0x3a0   :  { %v835_v12 = vpop.f32.mrf.mxu2  ;;  %v849_v13 = vpop.f32.mrf.mxu3 }
 0x3a1   :  { %v836_v15 = vadd.f32 %v835_v12, %v727_v14  ;;  %v1894_v12 = vld [vmem:[#allocation20] sm:$0xff] }
 0x3a2   :  { %1308 = vmatpush.bf16.msrb.mxu1 %v1894_v12 }
 0x3a3   :  { %v850_v17 = vadd.f32 %v849_v13, %v836_v15 }
 0x3a5   :  { %v854_v21 = vmax.f32 %v850_v17, 0.0 }
 0x3a8   :  { %v837_v16 = vpop.f32.mrf.mxu2  ;;  %v851_v19 = vpop.f32.mrf.mxu3 }
 0x3a9   :  { %v838_v18 = vadd.f32 %v837_v16, %v727_v14  ;;  %v1169_v14 = vld [vmem:[#allocation5 + $0x10] ss:$0 sm:$0xff] }
 0x3ab   :  { %v852_v20 = vadd.f32 %v851_v19, %v838_v18 }
 0x3ad   :  { %v855_v22 = vmax.f32 %v852_v20, 0.0 }
 0x3af   :  { %v874_v23 = vpack.c.bf16 %v855_v22, %v854_v21  ;;  %v1251_v21 = vld [vmem:[#allocation5 + $0x11] ss:$0 sm:$0xff] }
 0x3b1   :  { %968 = vmatmul.bf16.vlgmr.msra.gmra.mxu0 %v874_v23  ;;  %982 = vmatmul.bf16.vlgmr.msra.gmra.mxu1 %v874_v23 }
 0x42e   :  { %v969_v37 = vpop.f32.mrf.mxu0  ;;  %v983_v38 = vpop.f32.mrf.mxu1 }
 0x42f   :  { %v970_v41 = vadd.f32 %v969_v37, %v876_v39  ;;  %v984_v42 = vadd.f32 %v983_v38, %v877_v40 }
 0x431   :  { %v988_v47 = vmax.f32 %v970_v41, 0.0  ;;  %v989_v48 = vmax.f32 %v984_v42, 0.0 }
 0x436   :  { %v971_v43 = vpop.f32.mrf.mxu0  ;;  %v985_v44 = vpop.f32.mrf.mxu1 }
 0x437   :  { %v972_v45 = vadd.f32 %v971_v43, %v876_v39  ;;  %v986_v46 = vadd.f32 %v985_v44, %v877_v40 }
 0x439   :  { %v990_v49 = vmax.f32 %v972_v45, 0.0  ;;  %v991_v50 = vmax.f32 %v986_v46, 0.0 }
 0x43b   :  { %v1025_v51 = vpack.c.bf16 %v990_v49, %v988_v47  ;;  %v1026_v52 = vpack.c.bf16 %v991_v50, %v989_v48 }
 0x43d   :  { %1131 = vmatmul.bf16.vlgmr.msra.gmra.mxu2 %v1025_v51  ;;  %1145 = vmatmul.bf16.vlgmr.msra.gmra.mxu3 %v1026_v52 }
 0x4c0   :  { %v1132_v61 = vpop.f32.mrf.mxu2  ;;  %v1146_v62 = vpop.f32.mrf.mxu3 }
 0x4c1   :  { %v1133_v0 = vadd.f32 %v1132_v61, %v1024_v63 }
 0x4c3   :  { %v1147_v2 = vadd.f32 %v1146_v62, %v1133_v0 }
 0x4c5   :  { %v1151_v6 = vmax.f32 %v1147_v2, 0.0 }
 0x4c8   :  { %v1134_v1 = vpop.f32.mrf.mxu2  ;;  %v1148_v4 = vpop.f32.mrf.mxu3 }
 0x4c9   :  { %v1135_v3 = vadd.f32 %v1134_v1, %v1024_v63 }
 0x4cb   :  { %v1149_v5 = vadd.f32 %v1148_v4, %v1135_v3 }
 0x4cd   :  { %v1152_v7 = vmax.f32 %v1149_v5, 0.0 }
 0x4cf   :  { %v1170_v8 = vpack.c.bf16 %v1152_v7, %v1151_v6 }
 0x4d1   :  { %1227 = vmatmul.bf16.vlgmr.msrb.gmra.mxu0 %v1170_v8 }
 0x54e   :  { %v1228_v13 = vpop.f32.mrf.mxu0 }
 0x54f   :  { %v1229_v15 = vadd.f32 %v1228_v13, %v1169_v14 }
 0x551   :  { %v1233_v18 = vmax.f32 %v1229_v15, 0.0 }
 0x556   :  { %v1230_v16 = vpop.f32.mrf.mxu0 }
 0x557   :  { %v1231_v17 = vadd.f32 %v1230_v16, %v1169_v14 }
 0x559   :  { %v1234_v19 = vmax.f32 %v1231_v17, 0.0 }
 0x55b   :  { %v1252_v20 = vpack.c.bf16 %v1234_v19, %v1233_v18 }
 0x55d   :  { %1309 = vmatmul.bf16.vlgmr.msrb.gmra.mxu1 %v1252_v20 }
 0x5da   :  { %v1310_v22 = vpop.f32.mrf.mxu1 }
 0x5db   :  { %v1311_v23 = vadd.f32 %v1310_v22, %v1251_v21 }
 0x5dd   :  { %1315 = vst [vmem:[#allocation22] sm:$0xff] %v1311_v23 }
 0x5e2   :  { %v1312_v24 = vpop.f32.mrf.mxu1 }
 0x5e3   :  { %v1313_v25 = vadd.f32 %v1312_v24, %v1251_v21 }
 0x5e5   :  { %1316 = vst [vmem:[#allocation22 + $0x8] sm:$0xff] %v1313_v25 }
 0x5e6   :  { %1329 = dma.vmem_to_hbm [thread:$0]  %s1322_s1, 256, %s1324_s3, [#allocation4], %s2259_s14, %s2259_s14, %s2260_s15  }
 0x5e7   :  { %2247 = dma.done.wait [#allocation4], 256  }
 0x5e8   :  { %2248 = vsyncadd [#allocation4], 4294967040 }
 0x5e9   :  { %1334 = vsyncpa [#allocation3], 1 }
 0x5ea   :  { %1335 = vsyncpa [#allocation6], 1 }
 0x5eb   :  { %1336 = vsyncpa [#allocation9], 1 }
 0x5ec   :  { %1337 = vsyncpa [#allocation12], 1 }
 0x5ed   :  { %1338 = vsyncpa [#allocation15], 1 }
 0x5ee   :  { %1339 = vsyncpa [#allocation18], 1 }
 0x5ef   :  { %1340 = vsyncpa [#allocation21], 1 }
 0x5f0   :  { %1341 = vsyncpa [#allocation4], 1 }

// kernel: tpu_custom_call.1
= control target key start
LH: loop header
LB: loop body
LE: loop exit
PB: predicated region body
PF: predicated region fallthrough
CT: control target
= control target key end

     0   :  { %17 = vsyncpa [#allocation3], 0  ;;  %s2408_s0 = inlined_call_operand.hbm [shape: f32[16,128], index: 0, kind: input, shape index: {}]   ;;  %s2409_s1 = inlined_call_operand.hbm [shape: f32[10,256], index: 1, kind: input, shape index: {}]   ;;  %s2410_s2 = inlined_call_operand.hbm [shape: bf16[128,128], index: 2, kind: input, shape index: {}]   ;;  %s2411_s3 = inlined_call_operand.hbm [shape: bf16[128,128], index: 3, kind: input, shape index: {}]   ;;  %s2412_s4 = inlined_call_operand.hbm [shape: bf16[128,128], index: 4, kind: input, shape index: {}]   ;;  %s2413_s5 = inlined_call_operand.hbm [shape: bf16[128,128], index: 5, kind: input, shape index: {}]   ;;  %s2414_s6 = inlined_call_operand.hbm [shape: bf16[128,256], index: 6, kind: input, shape index: {}]   ;;  %s2415_s7 = inlined_call_operand.hbm [shape: bf16[256,128], index: 7, kind: input, shape index: {}]   ;;  %s2416_s8 = inlined_call_operand.hbm [shape: bf16[128,256], index: 8, kind: input, shape index: {}]   ;;  %s2417_s9 = inlined_call_operand.hbm [shape: bf16[256,128], index: 9, kind: input, shape index: {}]   ;;  %s2418_s10 = inlined_call_operand.hbm [shape: bf16[128,128], index: 10, kind: input, shape index: {}]   ;;  %s2419_s11 = inlined_call_operand.hbm [shape: bf16[128,128], index: 11, kind: input, shape index: {}]   ;;  %s2420_s12 = inlined_call_operand.hbm [shape: f32[16,128], index: 12, kind: output, shape index: {}]  }
   0x1   :  { %18 = vsyncpa [#allocation6], 0 }
   0x2   :  { %19 = vsyncpa [#allocation9], 0 }
   0x3   :  { %20 = vsyncpa [#allocation12], 0 }
   0x4   :  { %21 = vsyncpa [#allocation15], 0 }
   0x5   :  { %22 = vsyncpa [#allocation18], 0 }
   0x6   :  { %23 = vsyncpa [#allocation21], 0  ;;  %s42_s23 = sshll.u32 %s2409_s1, 4  ;;  %s43_s23 = int_to_ptr.hbm [resolvable:$true] %s42_s23 }
   0x7   :  { %24 = vsyncpa [#allocation4], 0  ;;  %s2249_s24 = smov [#allocation5]   ;;  %s2250_s26 = smov 256  }
   0x8   :  { %s44_s25 = sshll.u32 %s2249_s24, 4  ;;  %s2251_s27 = smov 16   ;;  %s45_s25 = int_to_ptr.vmem [resolvable:$true] %s44_s25 }
   0x9   :  { %50 = dma.hbm_to_vmem [thread:$0]  %s43_s23, 512, %s45_s25, [#allocation6], %s2250_s26, %s2250_s26, %s2251_s27  }
   0xa   :  { %s68_s30 = sshll.u32 %s2411_s3, 4  ;;  %s2252_s13 = smov [#allocation8]   ;;  %s69_s30 = int_to_ptr.hbm [resolvable:$true] %s68_s30 }
   0xb   :  { %s70_s14 = sshll.u32 %s2252_s13, 4  ;;  %s94_s17 = sshll.u32 %s2413_s5, 4  ;;  %s71_s14 = int_to_ptr.vmem [resolvable:$true] %s70_s14  ;;  %s95_s17 = int_to_ptr.hbm [resolvable:$true] %s94_s17 }
   0xc   :  { %s2253_s1 = smov 64   ;;  %s2254_s18 = smov 4  }
   0xd   :  { %76 = dma.hbm_to_vmem [thread:$0]  %s69_s30, 1024, %s71_s14, [#allocation9], %s2253_s1, %s2253_s1, %s2254_s18  }
   0xe   :  { %s120_s21 = sshll.u32 %s2415_s7, 4  ;;  %s2255_s3 = smov [#allocation11]   ;;  %s121_s21 = int_to_ptr.hbm [resolvable:$true] %s120_s21 }
   0xf   :  { %s96_s22 = sshll.u32 %s2255_s3, 4  ;;  %s2256_s5 = smov [#allocation14]   ;;  %s97_s22 = int_to_ptr.vmem [resolvable:$true] %s96_s22 }
  0x10   :  { %102 = dma.hbm_to_vmem [thread:$0]  %s95_s17, 1024, %s97_s22, [#allocation12], %s2253_s1, %s2253_s1, %s2254_s18  }
  0x11   :  { %s122_s23 = sshll.u32 %s2256_s5, 4  ;;  %s146_s26 = sshll.u32 %s2417_s9, 4  ;;  %s123_s23 = int_to_ptr.vmem [resolvable:$true] %s122_s23  ;;  %s147_s26 = int_to_ptr.hbm [resolvable:$true] %s146_s26 }
  0x12   :  { %128 = dma.hbm_to_vmem [thread:$0]  %s121_s21, 2048, %s123_s23, [#allocation15], %s2253_s1, %s2253_s1, %s2254_s18  }
  0x13   :  { %s29_s28 = sshll.u32 %s2408_s0, 4  ;;  %s2257_s29 = smov [#allocation17]   ;;  %s30_s28 = int_to_ptr.hbm [resolvable:$true] %s29_s28 }
  0x14   :  { %s148_s30 = sshll.u32 %s2257_s29, 4  ;;  %s2258_s13 = smov [#allocation2]   ;;  %s149_s30 = int_to_ptr.vmem [resolvable:$true] %s148_s30 }
  0x15   :  { %154 = dma.hbm_to_vmem [thread:$0]  %s147_s26, 2048, %s149_s30, [#allocation18], %s2253_s1, %s2253_s1, %s2254_s18  }
  0x16   :  { %s31_s9 = sshll.u32 %s2258_s13, 4  ;;  %s2259_s14 = smov 128   ;;  %s32_s9 = int_to_ptr.vmem [resolvable:$true] %s31_s9 }
  0x17   :  { %s2260_s15 = smov 8   ;;  %s55_s0 = sshll.u32 %s2410_s2, 4  ;;  %s56_s0 = int_to_ptr.hbm [resolvable:$true] %s55_s0 }
  0x18   :  { %37 = dma.hbm_to_vmem [thread:$0]  %s30_s28, 256, %s32_s9, [#allocation3], %s2259_s14, %s2259_s14, %s2260_s15  }
  0x19   :  { %s2261_s19 = smov [#allocation7]   ;;  %s81_s22 = sshll.u32 %s2412_s4, 4  ;;  %s82_s22 = int_to_ptr.hbm [resolvable:$true] %s81_s22 }
  0x1a   :  { %s57_s20 = sshll.u32 %s2261_s19, 4  ;;  %s2262_s5 = smov [#allocation10]   ;;  %s58_s20 = int_to_ptr.vmem [resolvable:$true] %s57_s20 }
  0x1b   :  { %63 = dma.hbm_to_vmem [thread:$0]  %s56_s0, 1024, %s58_s20, [#allocation6], %s2253_s1, %s2253_s1, %s2254_s18  }
  0x1c   :  { %s83_s23 = sshll.u32 %s2262_s5, 4  ;;  %s107_s26 = sshll.u32 %s2414_s6, 4  ;;  %s84_s23 = int_to_ptr.vmem [resolvable:$true] %s83_s23  ;;  %s108_s26 = int_to_ptr.hbm [resolvable:$true] %s107_s26 }
  0x1d   :  { %89 = dma.hbm_to_vmem [thread:$0]  %s82_s22, 1024, %s84_s23, [#allocation9], %s2253_s1, %s2253_s1, %s2254_s18  }
  0x1e   :  { %s133_s4 = sshll.u32 %s2416_s8, 4  ;;  %s2263_s27 = smov [#allocation13]   ;;  %s134_s4 = int_to_ptr.hbm [resolvable:$true] %s133_s4 }
  0x1f   :  { %s109_s28 = sshll.u32 %s2263_s27, 4  ;;  %s2264_s29 = smov [#allocation16]   ;;  %s110_s28 = int_to_ptr.vmem [resolvable:$true] %s109_s28 }
  0x20   :  { %115 = dma.hbm_to_vmem [thread:$0]  %s108_s26, 2048, %s110_s28, [#allocation12], %s2259_s14, %s2259_s14, %s2260_s15  }
  0x21   :  { %s135_s6 = sshll.u32 %s2264_s29, 4  ;;  %s159_s9 = sshll.u32 %s2418_s10, 4  ;;  %s136_s6 = int_to_ptr.vmem [resolvable:$true] %s135_s6  ;;  %s160_s9 = int_to_ptr.hbm [resolvable:$true] %s159_s9 }
  0x22   :  { %141 = dma.hbm_to_vmem [thread:$0]  %s134_s4, 2048, %s136_s6, [#allocation15], %s2259_s14, %s2259_s14, %s2260_s15  }
  0x23   :  { %s172_s17 = sshll.u32 %s2419_s11, 4  ;;  %s2265_s0 = smov [#allocation19]   ;;  %s173_s17 = int_to_ptr.hbm [resolvable:$true] %s172_s17 }
  0x24   :  { %s161_s19 = sshll.u32 %s2265_s0, 4  ;;  %s2266_s20 = smov [#allocation20]   ;;  %s162_s19 = int_to_ptr.vmem [resolvable:$true] %s161_s19 }
  0x25   :  { %167 = dma.hbm_to_vmem [thread:$0]  %s160_s9, 1024, %s162_s19, [#allocation18], %s2253_s1, %s2253_s1, %s2254_s18  }
  0x26   :  { %s174_s10 = sshll.u32 %s2266_s20, 4  ;;  %s175_s10 = int_to_ptr.vmem [resolvable:$true] %s174_s10 }
  0x27   :  { %180 = dma.hbm_to_vmem [thread:$0]  %s173_s17, 1024, %s175_s10, [#allocation21], %s2253_s1, %s2253_s1, %s2254_s18  }
  0x28   :  { %2233 = dma.done.wait [#allocation3], 256  }
  0x29   :  { %2234 = vsyncadd [#allocation3], 4294967040 }
  0x2a   :  { %2235 = dma.done.wait [#allocation6], 1536  }
  0x2b   :  { %2236 = vsyncadd [#allocation6], 4294965760 }
  0x2c   :  { %2237 = dma.done.wait [#allocation9], 2048  }
  0x2d   :  { %2238 = vsyncadd [#allocation9], 4294965248 }
  0x2e   :  { %2239 = dma.done.wait [#allocation12], 3072  }
  0x2f   :  { %2240 = vsyncadd [#allocation12], 4294964224 }
  0x30   :  { %2241 = dma.done.wait [#allocation15], 4096  }
  0x31   :  { %2242 = vsyncadd [#allocation15], 4294963200 }
  0x32   :  { %2243 = dma.done.wait [#allocation18], 3072  }
  0x33   :  { %2244 = vsyncadd [#allocation18], 4294964224 }
  0x34   :  { %2245 = dma.done.wait [#allocation21], 1024  }
  0x35   :  { %2246 = vsyncadd [#allocation21], 4294966272  ;;  %v1797_v0 = vld [vmem:[#allocation7 + $0x38] sm:$0xff]  ;;  %v1796_v1 = vld [vmem:[#allocation7 + $0x30] sm:$0xff]  ;;  %s2267_s11 = smov [#allocation22]   ;;  %s1323_s3 = sshll.u32 %s2420_s12, 4  ;;  %s1324_s3 = int_to_ptr.hbm [resolvable:$true] %s1323_s3 }
  0x36   :  { %297 = vmatpush.bf16.msra.mxu0 %v1797_v0  ;;  %v1805_v2 = vld [vmem:[#allocation8 + $0x38] sm:$0xff]  ;;  %v1804_v3 = vld [vmem:[#allocation8 + $0x30] sm:$0xff]  ;;  %v1795_v4 = vld [vmem:[#allocation7 + $0x28] sm:$0xff]  ;;  %s1321_s1 = sshll.u32 %s2267_s11, 4  ;;  %s1322_s1 = int_to_ptr.vmem [resolvable:$true] %s1321_s1 }
  0x37   :  { %379 = vmatpush.bf16.msra.mxu1 %v1805_v2  ;;  %v1803_v5 = vld [vmem:[#allocation8 + $0x28] sm:$0xff]  ;;  %v1794_v6 = vld [vmem:[#allocation7 + $0x20] sm:$0xff]  ;;  %v1793_v8 = vld [vmem:[#allocation7 + $0x18] sm:$0xff] }
  0x38   :  { %v1802_v7 = vld [vmem:[#allocation8 + $0x20] sm:$0xff]  ;;  %v1792_v9 = vld [vmem:[#allocation7 + $0x10] sm:$0xff]  ;;  %v1791_v10 = vld [vmem:[#allocation7 + $0x8] sm:$0xff] }
  0x39   :  { %v1790_v11 = vld [vmem:[#allocation7] sm:$0xff]  ;;  %v229_v12 = vld [vmem:[#allocation2] sm:$0xff]  ;;  %v230_v13 = vld [vmem:[#allocation2 + $0x8] sm:$0xff] }
  0x3a   :  { %298 = vmatpush.bf16.msra.mxu0 %v1796_v1  ;;  %v248_v14 = vpack.c.bf16 %v230_v13, %v229_v12  ;;  %v1801_v15 = vld [vmem:[#allocation8 + $0x18] sm:$0xff]  ;;  %v1800_v16 = vld [vmem:[#allocation8 + $0x10] sm:$0xff]  ;;  %v1799_v17 = vld [vmem:[#allocation8 + $0x8] sm:$0xff] }
  0x3b   :  { %380 = vmatpush.bf16.msra.mxu1 %v1804_v3  ;;  %v1798_v18 = vld [vmem:[#allocation8] sm:$0xff]  ;;  %v1813_v19 = vld [vmem:[#allocation10 + $0x38] sm:$0xff]  ;;  %v1812_v20 = vld [vmem:[#allocation10 + $0x30] sm:$0xff] }
  0x3c   :  { %461 = vmatpush.bf16.msra.mxu2 %v1813_v19  ;;  %v1811_v21 = vld [vmem:[#allocation10 + $0x28] sm:$0xff]  ;;  %v1810_v22 = vld [vmem:[#allocation10 + $0x20] sm:$0xff]  ;;  %v1809_v31 = vld [vmem:[#allocation10 + $0x18] sm:$0xff] }
  0x3d   :  { %v247_v24 = vld [vmem:[#allocation5] ss:$0 sm:$0xff]  ;;  %v1808_v32 = vld [vmem:[#allocation10 + $0x10] sm:$0xff]  ;;  %v1807_v33 = vld [vmem:[#allocation10 + $0x8] sm:$0xff] }
  0x3e   :  { %299 = vmatpush.bf16.msra.mxu0 %v1795_v4  ;;  %v1806_v34 = vld [vmem:[#allocation10] sm:$0xff]  ;;  %v1821_v35 = vld [vmem:[#allocation11 + $0x38] sm:$0xff]  ;;  %v1820_v36 = vld [vmem:[#allocation11 + $0x30] sm:$0xff] }
  0x3f   :  { %381 = vmatpush.bf16.msra.mxu1 %v1803_v5  ;;  %543 = vmatpush.bf16.msra.mxu3 %v1821_v35  ;;  %v1819_v37 = vld [vmem:[#allocation11 + $0x28] sm:$0xff]  ;;  %v1818_v38 = vld [vmem:[#allocation11 + $0x20] sm:$0xff]  ;;  %v1817_v47 = vld [vmem:[#allocation11 + $0x18] sm:$0xff] }
  0x40   :  { %462 = vmatpush.bf16.msra.mxu2 %v1812_v20  ;;  %v329_v40 = vld [vmem:[#allocation5 + $0x1] ss:$0 sm:$0xff]  ;;  %v1816_v48 = vld [vmem:[#allocation11 + $0x10] sm:$0xff]  ;;  %v1815_v49 = vld [vmem:[#allocation11 + $0x8] sm:$0xff] }
  0x41   :  { %v1814_v50 = vld [vmem:[#allocation11] sm:$0xff]  ;;  %v1528_v51 = vld [vmem:[#allocation13 + $0x70] sm:$0xf]  ;;  %v1837_v52 = vld [vmem:[#allocation13 + $0x74] sm:$0xf0] }
  0x42   :  { %300 = vmatpush.bf16.msra.mxu0 %v1794_v6  ;;  %v1836_v53 = vld [vmem:[#allocation13 + $0x74] sm:$0xf]  ;;  %v1529_v54 = vor.u32 %v1837_v52, %v1528_v51  ;;  %v1530_v55 = vld [vmem:[#allocation13 + $0x78] sm:$0xf0]  ;;  %v1520_v56 = vld [vmem:[#allocation13 + $0x60] sm:$0xf] }
  0x43   :  { %382 = vmatpush.bf16.msra.mxu1 %v1802_v7  ;;  %544 = vmatpush.bf16.msra.mxu3 %v1820_v36  ;;  %v1835_v57 = vld [vmem:[#allocation13 + $0x64] sm:$0xf0]  ;;  %v1533_v58 = vor.u32 %v1836_v53, %v1530_v55  ;;  %v1834_v59 = vld [vmem:[#allocation13 + $0x64] sm:$0xf]  ;;  %v1522_v60 = vld [vmem:[#allocation13 + $0x68] sm:$0xf0] }
  0x44   :  { %463 = vmatpush.bf16.msra.mxu2 %v1811_v21  ;;  %v1521_v61 = vor.u32 %v1835_v57, %v1520_v56  ;;  %v1525_v62 = vor.u32 %v1834_v59, %v1522_v60  ;;  %v1512_v63 = vld [vmem:[#allocation13 + $0x50] sm:$0xf]  ;;  %v1833_v0 = vld [vmem:[#allocation13 + $0x54] sm:$0xf0]  ;;  %v1832_v1 = vld [vmem:[#allocation13 + $0x54] sm:$0xf] }
  0x45   :  { %v1514_v2 = vld [vmem:[#allocation13 + $0x58] sm:$0xf0]  ;;  %v1513_v3 = vor.u32 %v1833_v0, %v1512_v63  ;;  %v1504_v5 = vld [vmem:[#allocation13 + $0x40] sm:$0xf]  ;;  %v1831_v6 = vld [vmem:[#allocation13 + $0x44] sm:$0xf0] }
  0x46   :  { %301 = vmatpush.bf16.msra.mxu0 %v1793_v8  ;;  %v1517_v4 = vor.u32 %v1832_v1, %v1514_v2  ;;  %v1830_v7 = vld [vmem:[#allocation13 + $0x44] sm:$0xf]  ;;  %v1506_v8 = vld [vmem:[#allocation13 + $0x48] sm:$0xf0]  ;;  %v411_v12 = vld [vmem:[#allocation5 + $0x2] ss:$0 sm:$0xff] }
  0x47   :  { %383 = vmatpush.bf16.msra.mxu1 %v1801_v15  ;;  %545 = vmatpush.bf16.msra.mxu3 %v1819_v37  ;;  %v1496_v19 = vld [vmem:[#allocation13 + $0x30] sm:$0xf]  ;;  %v1829_v20 = vld [vmem:[#allocation13 + $0x34] sm:$0xf0]  ;;  %v1828_v21 = vld [vmem:[#allocation13 + $0x34] sm:$0xf] }
  0x48   :  { %464 = vmatpush.bf16.msra.mxu2 %v1810_v22  ;;  %v1497_v22 = vor.u32 %v1829_v20, %v1496_v19  ;;  %v1482_v35 = vld [vmem:[#allocation13 + $0x18] sm:$0xf0]  ;;  %v1472_v37 = vld [vmem:[#allocation13] sm:$0xf]  ;;  %v1839_v63 = vld [vmem:[#allocation14 + $0x8] sm:$0xff] }
  0x49   :  { %v493_v52 = vld [vmem:[#allocation5 + $0x3] ss:$0 sm:$0xff]  ;;  %v1841_v59 = vld [vmem:[#allocation14 + $0x18] sm:$0xff]  ;;  %v1847_v0 = vld [vmem:[#allocation14 + $0x48] sm:$0xff] }
  0x4a   :  { %302 = vmatpush.bf16.msra.mxu0 %v1792_v9  ;;  %v1505_v9 = vor.u32 %v1831_v6, %v1504_v5  ;;  %v1849_v60 = vld [vmem:[#allocation14 + $0x58] sm:$0xff]  ;;  %v1838_v1 = vld [vmem:[#allocation14] sm:$0xff]  ;;  %v1868_v5 = vld [vmem:[#allocation16 + $0x74] sm:$0xf] }
  0x4b   :  { %384 = vmatpush.bf16.msra.mxu1 %v1800_v16  ;;  %546 = vmatpush.bf16.msra.mxu3 %v1818_v38  ;;  %v1823_v38 = vld [vmem:[#allocation13 + $0x4] sm:$0xf0]  ;;  %v1846_v2 = vld [vmem:[#allocation14 + $0x40] sm:$0xff] }
  0x4c   :  { %465 = vmatpush.bf16.msra.mxu2 %v1809_v31  ;;  %v1480_v31 = vld [vmem:[#allocation13 + $0x10] sm:$0xf] }
  0x4e   :  { %303 = vmatpush.bf16.msra.mxu0 %v1791_v10  ;;  %v1509_v10 = vor.u32 %v1830_v7, %v1506_v8  ;;  %v1658_v7 = vld [vmem:[#allocation16 + $0x78] sm:$0xf0]  ;;  %v1648_v8 = vld [vmem:[#allocation16 + $0x60] sm:$0xf] }
  0x4f   :  { %385 = vmatpush.bf16.msra.mxu1 %v1799_v17  ;;  %547 = vmatpush.bf16.msra.mxu3 %v1817_v47  ;;  %v1843_v47 = vld [vmem:[#allocation14 + $0x28] sm:$0xff] }
  0x50   :  { %466 = vmatpush.bf16.msra.mxu2 %v1808_v32  ;;  %v1825_v32 = vld [vmem:[#allocation13 + $0x14] sm:$0xf0] }
  0x52   :  { %304 = vmatpush.bf16.msra.mxu0 %v1790_v11 }
  0x53   :  { %386 = vmatpush.bf16.msra.mxu1 %v1798_v18  ;;  %548 = vmatpush.bf16.msra.mxu3 %v1816_v48  ;;  %v1851_v48 = vld [vmem:[#allocation14 + $0x68] sm:$0xff] }
  0x54   :  { %467 = vmatpush.bf16.msra.mxu2 %v1807_v33  ;;  %v1824_v33 = vld [vmem:[#allocation13 + $0x14] sm:$0xf] }
  0x55   :  { %305 = vmatmul.bf16.vlgmr.msra.gmra.mxu0 %v248_v14  ;;  %v1485_v36 = vor.u32 %v1824_v33, %v1482_v35 }
  0x56   :  { %663 = vmatpush.bf16.msrb.mxu0 %v1529_v54 }
  0x57   :  { %549 = vmatpush.bf16.msra.mxu3 %v1815_v49  ;;  %677 = vmatpush.bf16.msrb.mxu1 %v1533_v58  ;;  %v1842_v49 = vld [vmem:[#allocation14 + $0x20] sm:$0xff] }
  0x58   :  { %468 = vmatpush.bf16.msra.mxu2 %v1806_v34  ;;  %v1481_v34 = vor.u32 %v1825_v32, %v1480_v31 }
  0x5a   :  { %664 = vmatpush.bf16.msrb.mxu0 %v1521_v61  ;;  %v1840_v61 = vld [vmem:[#allocation14 + $0x10] sm:$0xff] }
  0x5b   :  { %550 = vmatpush.bf16.msra.mxu3 %v1814_v50  ;;  %678 = vmatpush.bf16.msrb.mxu1 %v1525_v62  ;;  %v1850_v50 = vld [vmem:[#allocation14 + $0x60] sm:$0xff]  ;;  %v1848_v62 = vld [vmem:[#allocation14 + $0x50] sm:$0xff] }
  0x5e   :  { %665 = vmatpush.bf16.msrb.mxu0 %v1513_v3  ;;  %v1656_v3 = vld [vmem:[#allocation16 + $0x70] sm:$0xf] }
  0x5f   :  { %679 = vmatpush.bf16.msrb.mxu1 %v1517_v4  ;;  %v1869_v4 = vld [vmem:[#allocation16 + $0x74] sm:$0xf0] }
  0x60   :  { %v1657_v6 = vor.u32 %v1869_v4, %v1656_v3  ;;  %v1877_v4 = vld [vmem:[#allocation17 + $0x38] sm:$0xff] }
  0x62   :  { %666 = vmatpush.bf16.msrb.mxu0 %v1505_v9  ;;  %v1867_v9 = vld [vmem:[#allocation16 + $0x64] sm:$0xf0] }
  0x63   :  { %680 = vmatpush.bf16.msrb.mxu1 %v1509_v10  ;;  %v1661_v10 = vor.u32 %v1868_v5, %v1658_v7  ;;  %v1885_v5 = vld [vmem:[#allocation17 + $0x78] sm:$0xff]  ;;  %v1884_v7 = vld [vmem:[#allocation17 + $0x70] sm:$0xff] }
  0x66   :  { %667 = vmatpush.bf16.msrb.mxu0 %v1497_v22  ;;  %v1863_v22 = vld [vmem:[#allocation16 + $0x44] sm:$0xf0] }
  0xd2   :  { %v306_v23 = vpop.f32.mrf.mxu0 }
  0xd3   :  { %v307_v25 = vadd.f32 %v306_v23, %v247_v24  ;;  %v1498_v23 = vld [vmem:[#allocation13 + $0x38] sm:$0xf0] }
  0xd5   :  { %v311_v28 = vmax.f32 %v307_v25, 0.0  ;;  %v1488_v25 = vld [vmem:[#allocation13 + $0x20] sm:$0xf] }
  0xda   :  { %v308_v26 = vpop.f32.mrf.mxu0 }
  0xdb   :  { %v309_v27 = vadd.f32 %v308_v26, %v247_v24  ;;  %v1501_v24 = vor.u32 %v1828_v21, %v1498_v23  ;;  %v1827_v26 = vld [vmem:[#allocation13 + $0x24] sm:$0xf0]  ;;  %v1632_v21 = vld [vmem:[#allocation16 + $0x40] sm:$0xf]  ;;  %v1862_v23 = vld [vmem:[#allocation16 + $0x44] sm:$0xf] }
  0xdd   :  { %v312_v29 = vmax.f32 %v309_v27, 0.0  ;;  %681 = vmatpush.bf16.msrb.mxu1 %v1501_v24  ;;  %v1826_v27 = vld [vmem:[#allocation13 + $0x24] sm:$0xf]  ;;  %v1634_v24 = vld [vmem:[#allocation16 + $0x48] sm:$0xf0] }
  0xdf   :  { %v330_v30 = vpack.c.bf16 %v312_v29, %v311_v28  ;;  %v1489_v28 = vor.u32 %v1827_v26, %v1488_v25  ;;  %v1490_v29 = vld [vmem:[#allocation13 + $0x28] sm:$0xf0]  ;;  %v1633_v25 = vor.u32 %v1863_v22, %v1632_v21  ;;  %v1637_v26 = vor.u32 %v1862_v23, %v1634_v24  ;;  %v1873_v24 = vld [vmem:[#allocation17 + $0x18] sm:$0xff] }
  0xe1   :  { %387 = vmatmul.bf16.vlgmr.msra.gmra.mxu1 %v330_v30  ;;  %v1493_v30 = vor.u32 %v1826_v27, %v1490_v29  ;;  %668 = vmatpush.bf16.msrb.mxu0 %v1489_v28  ;;  %v576_v27 = vld [vmem:[#allocation5 + $0x4] ss:$8 sm:$0x3] }
  0xe2   :  { %v580_v31 = vperm.slane %v576_v27, 1 }
  0xe3   :  { %682 = vmatpush.bf16.msrb.mxu1 %v1493_v30  ;;  %v579_v30 = vperm.slane %v576_v27, 0  ;;  %v1880_v27 = vld [vmem:[#allocation17 + $0x50] sm:$0xff] }
  0xe5   :  { %669 = vmatpush.bf16.msrb.mxu0 %v1481_v34 }
  0xe7   :  { %683 = vmatpush.bf16.msrb.mxu1 %v1485_v36 }
 0x15e   :  { %v388_v39 = vpop.f32.mrf.mxu1 }
 0x15f   :  { %v389_v41 = vadd.f32 %v388_v39, %v329_v40  ;;  %v1822_v39 = vld [vmem:[#allocation13 + $0x4] sm:$0xf] }
 0x161   :  { %v393_v44 = vmax.f32 %v389_v41, 0.0  ;;  %v1474_v41 = vld [vmem:[#allocation13 + $0x8] sm:$0xf0] }
 0x166   :  { %v390_v42 = vpop.f32.mrf.mxu1 }
 0x167   :  { %v391_v43 = vadd.f32 %v390_v42, %v329_v40  ;;  %v1473_v40 = vor.u32 %v1823_v38, %v1472_v37  ;;  %v1477_v42 = vor.u32 %v1822_v39, %v1474_v41 }
 0x169   :  { %v394_v45 = vmax.f32 %v391_v43, 0.0  ;;  %670 = vmatpush.bf16.msrb.mxu0 %v1473_v40  ;;  %684 = vmatpush.bf16.msrb.mxu1 %v1477_v42  ;;  %v1845_v43 = vld [vmem:[#allocation14 + $0x38] sm:$0xff] }
 0x16a   :  { %826 = vmatpush.bf16.msrb.mxu2 %v1845_v43 }
 0x16b   :  { %v412_v46 = vpack.c.bf16 %v394_v45, %v393_v44  ;;  %v1853_v44 = vld [vmem:[#allocation14 + $0x78] sm:$0xff]  ;;  %v1844_v45 = vld [vmem:[#allocation14 + $0x30] sm:$0xff] }
 0x16c   :  { %840 = vmatpush.bf16.msrb.mxu3 %v1853_v44  ;;  %v1624_v44 = vld [vmem:[#allocation16 + $0x30] sm:$0xf] }
 0x16d   :  { %469 = vmatmul.bf16.vlgmr.msra.gmra.mxu2 %v412_v46  ;;  %v1852_v46 = vld [vmem:[#allocation14 + $0x70] sm:$0xff]  ;;  %960 = vmatpush.bf16.msra.mxu0 %v1657_v6 }
 0x16e   :  { %827 = vmatpush.bf16.msrb.mxu2 %v1844_v45  ;;  %974 = vmatpush.bf16.msra.mxu1 %v1661_v10  ;;  %v1861_v45 = vld [vmem:[#allocation16 + $0x34] sm:$0xf0]  ;;  %v1876_v6 = vld [vmem:[#allocation17 + $0x30] sm:$0xff]  ;;  %v1874_v10 = vld [vmem:[#allocation17 + $0x20] sm:$0xff] }
 0x170   :  { %841 = vmatpush.bf16.msrb.mxu3 %v1852_v46  ;;  %v1860_v46 = vld [vmem:[#allocation16 + $0x34] sm:$0xf] }
 0x172   :  { %828 = vmatpush.bf16.msrb.mxu2 %v1843_v47  ;;  %v1625_v47 = vor.u32 %v1861_v45, %v1624_v44 }
 0x174   :  { %842 = vmatpush.bf16.msrb.mxu3 %v1851_v48  ;;  %v1626_v48 = vld [vmem:[#allocation16 + $0x38] sm:$0xf0] }
 0x176   :  { %829 = vmatpush.bf16.msrb.mxu2 %v1842_v49  ;;  %v1629_v49 = vor.u32 %v1860_v46, %v1626_v48 }
 0x178   :  { %843 = vmatpush.bf16.msrb.mxu3 %v1850_v50  ;;  %v1616_v50 = vld [vmem:[#allocation16 + $0x20] sm:$0xf] }
 0x17a   :  { %830 = vmatpush.bf16.msrb.mxu2 %v1841_v59 }
 0x17c   :  { %844 = vmatpush.bf16.msrb.mxu3 %v1849_v60  ;;  %v1610_v60 = vld [vmem:[#allocation16 + $0x18] sm:$0xf0] }
 0x17e   :  { %831 = vmatpush.bf16.msrb.mxu2 %v1840_v61 }
 0x180   :  { %845 = vmatpush.bf16.msrb.mxu3 %v1848_v62  ;;  %v1600_v62 = vld [vmem:[#allocation16] sm:$0xf] }
 0x182   :  { %832 = vmatpush.bf16.msrb.mxu2 %v1839_v63  ;;  %v1855_v63 = vld [vmem:[#allocation16 + $0x4] sm:$0xf0] }
 0x184   :  { %846 = vmatpush.bf16.msrb.mxu3 %v1847_v0  ;;  %v1854_v0 = vld [vmem:[#allocation16 + $0x4] sm:$0xf] }
 0x186   :  { %833 = vmatpush.bf16.msrb.mxu2 %v1838_v1  ;;  %v1601_v1 = vor.u32 %v1855_v63, %v1600_v62  ;;  %v1024_v63 = vld [vmem:[#allocation5 + $0x7] ss:$0 sm:$0xff] }
 0x188   :  { %847 = vmatpush.bf16.msrb.mxu3 %v1846_v2  ;;  %v1602_v2 = vld [vmem:[#allocation16 + $0x8] sm:$0xf0] }
 0x189   :  { %v1605_v3 = vor.u32 %v1854_v0, %v1602_v2 }
 0x18a   :  { %1123 = vmatpush.bf16.msra.mxu2 %v1877_v4 }
 0x18e   :  { %1124 = vmatpush.bf16.msra.mxu2 %v1876_v6 }
 0x1f0   :  { %v470_v11 = vpop.f32.mrf.mxu2 }
 0x1f1   :  { %v471_v13 = vadd.f32 %v470_v11, %v411_v12  ;;  %v1866_v11 = vld [vmem:[#allocation16 + $0x64] sm:$0xf] }
 0x1f3   :  { %v475_v16 = vmax.f32 %v471_v13, 0.0  ;;  %v1649_v13 = vor.u32 %v1867_v9, %v1648_v8  ;;  %v1875_v8 = vld [vmem:[#allocation17 + $0x28] sm:$0xff] }
 0x1f4   :  { %v1883_v9 = vld [vmem:[#allocation17 + $0x68] sm:$0xff]  ;;  %1125 = vmatpush.bf16.msra.mxu2 %v1875_v8 }
 0x1f5   :  { %961 = vmatpush.bf16.msra.mxu0 %v1649_v13 }
 0x1f8   :  { %v472_v14 = vpop.f32.mrf.mxu2  ;;  %1126 = vmatpush.bf16.msra.mxu2 %v1874_v10  ;;  %v1896_v10 = vld [vmem:[#allocation20 + $0x10] sm:$0xff] }
 0x1f9   :  { %v473_v15 = vadd.f32 %v472_v14, %v411_v12  ;;  %v1650_v12 = vld [vmem:[#allocation16 + $0x68] sm:$0xf0] }
 0x1fa   :  { %v1653_v14 = vor.u32 %v1866_v11, %v1650_v12  ;;  %v1882_v11 = vld [vmem:[#allocation17 + $0x60] sm:$0xff] }
 0x1fb   :  { %v476_v17 = vmax.f32 %v473_v15, 0.0  ;;  %v1640_v15 = vld [vmem:[#allocation16 + $0x50] sm:$0xf] }
 0x1fc   :  { %975 = vmatpush.bf16.msra.mxu1 %v1653_v14  ;;  %v727_v14 = vld [vmem:[#allocation5 + $0x5] ss:$0 sm:$0xff]  ;;  %1127 = vmatpush.bf16.msra.mxu2 %v1873_v24 }
 0x1fd   :  { %v494_v18 = vpack.c.bf16 %v476_v17, %v475_v16  ;;  %v1865_v16 = vld [vmem:[#allocation16 + $0x54] sm:$0xf0]  ;;  %v1864_v17 = vld [vmem:[#allocation16 + $0x54] sm:$0xf] }
 0x1fe   :  { %v1641_v19 = vor.u32 %v1865_v16, %v1640_v15 }
 0x1ff   :  { %551 = vmatmul.bf16.vlgmr.msra.gmra.mxu3 %v494_v18  ;;  %v1642_v18 = vld [vmem:[#allocation16 + $0x58] sm:$0xf0] }
 0x200   :  { %v1645_v20 = vor.u32 %v1864_v17, %v1642_v18  ;;  %962 = vmatpush.bf16.msra.mxu0 %v1641_v19  ;;  %1137 = vmatpush.bf16.msra.mxu3 %v1885_v5 }
 0x202   :  { %976 = vmatpush.bf16.msra.mxu1 %v1645_v20 }
 0x204   :  { %963 = vmatpush.bf16.msra.mxu0 %v1633_v25  ;;  %1138 = vmatpush.bf16.msra.mxu3 %v1884_v7  ;;  %v1881_v25 = vld [vmem:[#allocation17 + $0x58] sm:$0xff] }
 0x206   :  { %977 = vmatpush.bf16.msra.mxu1 %v1637_v26  ;;  %v1872_v26 = vld [vmem:[#allocation17 + $0x10] sm:$0xff] }
 0x207   :  { %1128 = vmatpush.bf16.msra.mxu2 %v1872_v26 }
 0x208   :  { %964 = vmatpush.bf16.msra.mxu0 %v1625_v47  ;;  %1139 = vmatpush.bf16.msra.mxu3 %v1883_v9  ;;  %v1897_v9 = vld [vmem:[#allocation20 + $0x18] sm:$0xff] }
 0x20a   :  { %978 = vmatpush.bf16.msra.mxu1 %v1629_v49 }
 0x20c   :  { %1140 = vmatpush.bf16.msra.mxu3 %v1882_v11  ;;  %v1895_v11 = vld [vmem:[#allocation20 + $0x8] sm:$0xff] }
 0x210   :  { %1141 = vmatpush.bf16.msra.mxu3 %v1881_v25 }
 0x214   :  { %1142 = vmatpush.bf16.msra.mxu3 %v1880_v27 }
 0x282   :  { %v552_v51 = vpop.f32.mrf.mxu3 }
 0x283   :  { %v553_v53 = vadd.f32 %v552_v51, %v493_v52  ;;  %v1859_v51 = vld [vmem:[#allocation16 + $0x24] sm:$0xf0] }
 0x285   :  { %v557_v56 = vmax.f32 %v553_v53, 0.0  ;;  %v1617_v53 = vor.u32 %v1859_v51, %v1616_v50 }
 0x287   :  { %965 = vmatpush.bf16.msra.mxu0 %v1617_v53  ;;  %v1889_v53 = vld [vmem:[#allocation19 + $0x18] sm:$0xff] }
 0x28a   :  { %v554_v54 = vpop.f32.mrf.mxu3 }
 0x28b   :  { %v555_v55 = vadd.f32 %v554_v54, %v493_v52  ;;  %v1858_v52 = vld [vmem:[#allocation16 + $0x24] sm:$0xf]  ;;  %v1618_v54 = vld [vmem:[#allocation16 + $0x28] sm:$0xf0] }
 0x28d   :  { %v558_v57 = vmax.f32 %v555_v55, 0.0  ;;  %v1621_v55 = vor.u32 %v1858_v52, %v1618_v54  ;;  %v1888_v54 = vld [vmem:[#allocation19 + $0x10] sm:$0xff] }
 0x28f   :  { %v577_v58 = vpack.c.bf16 %v558_v57, %v557_v56  ;;  %979 = vmatpush.bf16.msra.mxu1 %v1621_v55  ;;  %v1608_v56 = vld [vmem:[#allocation16 + $0x10] sm:$0xf]  ;;  %v1857_v57 = vld [vmem:[#allocation16 + $0x14] sm:$0xf0]  ;;  %v1887_v55 = vld [vmem:[#allocation19 + $0x8] sm:$0xff] }
 0x290   :  { %v1609_v59 = vor.u32 %v1857_v57, %v1608_v56  ;;  %v1886_v56 = vld [vmem:[#allocation19] sm:$0xff]  ;;  %v1901_v57 = vld [vmem:[#allocation20 + $0x38] sm:$0xff] }
 0x291   :  { %671 = vmatmul.bf16.vlgmr.msrb.gmra.mxu0 %v577_v58  ;;  %685 = vmatmul.bf16.vlgmr.msrb.gmra.mxu1 %v577_v58  ;;  %v1856_v58 = vld [vmem:[#allocation16 + $0x14] sm:$0xf] }
 0x292   :  { %v1613_v61 = vor.u32 %v1856_v58, %v1610_v60  ;;  %966 = vmatpush.bf16.msra.mxu0 %v1609_v59  ;;  %v1900_v58 = vld [vmem:[#allocation20 + $0x30] sm:$0xff]  ;;  %v1899_v59 = vld [vmem:[#allocation20 + $0x28] sm:$0xff]  ;;  %v1898_v60 = vld [vmem:[#allocation20 + $0x20] sm:$0xff] }
 0x294   :  { %980 = vmatpush.bf16.msra.mxu1 %v1613_v61 }
 0x296   :  { %967 = vmatpush.bf16.msra.mxu0 %v1601_v1 }
 0x298   :  { %981 = vmatpush.bf16.msra.mxu1 %v1605_v3 }
 0x29c   :  { %1301 = vmatpush.bf16.msrb.mxu1 %v1901_v57 }
 0x2a0   :  { %1302 = vmatpush.bf16.msrb.mxu1 %v1900_v58 }
 0x2a4   :  { %1303 = vmatpush.bf16.msrb.mxu1 %v1899_v59 }
 0x2a8   :  { %1304 = vmatpush.bf16.msrb.mxu1 %v1898_v60 }
 0x2ac   :  { %1305 = vmatpush.bf16.msrb.mxu1 %v1897_v9 }
 0x2b0   :  { %1306 = vmatpush.bf16.msrb.mxu1 %v1896_v10 }
 0x2b4   :  { %1307 = vmatpush.bf16.msrb.mxu1 %v1895_v11 }
 0x30e   :  { %v672_v28 = vpop.f32.mrf.mxu0  ;;  %v686_v29 = vpop.f32.mrf.mxu1 }
 0x30f   :  { %v673_v32 = vadd.f32 %v672_v28, %v579_v30  ;;  %v687_v33 = vadd.f32 %v686_v29, %v580_v31  ;;  %v1871_v28 = vld [vmem:[#allocation17 + $0x8] sm:$0xff] }
 0x310   :  { %v1879_v29 = vld [vmem:[#allocation17 + $0x48] sm:$0xff]  ;;  %1129 = vmatpush.bf16.msra.mxu2 %v1871_v28 }
 0x311   :  { %v691_v38 = vmax.f32 %v673_v32, 0.0  ;;  %v692_v39 = vmax.f32 %v687_v33, 0.0  ;;  %1143 = vmatpush.bf16.msra.mxu3 %v1879_v29  ;;  %v1893_v32 = vld [vmem:[#allocation19 + $0x38] sm:$0xff]  ;;  %v1892_v33 = vld [vmem:[#allocation19 + $0x30] sm:$0xff] }
 0x312   :  { %1219 = vmatpush.bf16.msrb.mxu0 %v1893_v32 }
 0x316   :  { %v674_v34 = vpop.f32.mrf.mxu0  ;;  %v688_v35 = vpop.f32.mrf.mxu1  ;;  %1220 = vmatpush.bf16.msrb.mxu0 %v1892_v33 }
 0x317   :  { %v675_v36 = vadd.f32 %v674_v34, %v579_v30  ;;  %v689_v37 = vadd.f32 %v688_v35, %v580_v31  ;;  %v1870_v30 = vld [vmem:[#allocation17] sm:$0xff]  ;;  %v1891_v34 = vld [vmem:[#allocation19 + $0x28] sm:$0xff] }
 0x318   :  { %v1878_v31 = vld [vmem:[#allocation17 + $0x40] sm:$0xff]  ;;  %1130 = vmatpush.bf16.msra.mxu2 %v1870_v30 }
 0x319   :  { %v693_v40 = vmax.f32 %v675_v36, 0.0  ;;  %v694_v41 = vmax.f32 %v689_v37, 0.0  ;;  %1144 = vmatpush.bf16.msra.mxu3 %v1878_v31  ;;  %v1890_v35 = vld [vmem:[#allocation19 + $0x20] sm:$0xff] }
 0x31a   :  { %1221 = vmatpush.bf16.msrb.mxu0 %v1891_v34  ;;  %v873_v36 = vld [vmem:[#allocation5 + $0x6] ss:$8 sm:$0x3] }
 0x31b   :  { %v728_v42 = vpack.c.bf16 %v693_v40, %v691_v38  ;;  %v729_v43 = vpack.c.bf16 %v694_v41, %v692_v39  ;;  %v876_v39 = vperm.slane %v873_v36, 0  ;;  %v877_v40 = vperm.slane %v873_v36, 1 }
 0x31d   :  { %834 = vmatmul.bf16.vlgmr.msrb.gmra.mxu2 %v728_v42  ;;  %848 = vmatmul.bf16.vlgmr.msrb.gmra.mxu3 %v729_v43 }
 0x31e   :  { %1222 = vmatpush.bf16.msrb.mxu0 %v1890_v35 }
 0x322   :  { %1223 = vmatpush.bf16.msrb.mxu0 %v1889_v53 }
 0x326   :  { %1224 = vmatpush.bf16.msrb.mxu0 %v1888_v54 }
 0x32a   :  { %1225 = vmatpush.bf16.msrb.mxu0 %v1887_v55 }
 0x32e   :  { %1226 = vmatpush.bf16.msrb.mxu0 %v1886_v56 }
 0x3a0   :  { %v835_v12 = vpop.f32.mrf.mxu2  ;;  %v849_v13 = vpop.f32.mrf.mxu3 }
 0x3a1   :  { %v836_v15 = vadd.f32 %v835_v12, %v727_v14  ;;  %v1894_v12 = vld [vmem:[#allocation20] sm:$0xff] }
 0x3a2   :  { %1308 = vmatpush.bf16.msrb.mxu1 %v1894_v12 }
 0x3a3   :  { %v850_v17 = vadd.f32 %v849_v13, %v836_v15 }
 0x3a5   :  { %v854_v21 = vmax.f32 %v850_v17, 0.0 }
 0x3a8   :  { %v837_v16 = vpop.f32.mrf.mxu2  ;;  %v851_v19 = vpop.f32.mrf.mxu3 }
 0x3a9   :  { %v838_v18 = vadd.f32 %v837_v16, %v727_v14  ;;  %v1169_v14 = vld [vmem:[#allocation5 + $0x10] ss:$0 sm:$0xff] }
 0x3ab   :  { %v852_v20 = vadd.f32 %v851_v19, %v838_v18 }
 0x3ad   :  { %v855_v22 = vmax.f32 %v852_v20, 0.0 }
 0x3af   :  { %v874_v23 = vpack.c.bf16 %v855_v22, %v854_v21  ;;  %v1251_v21 = vld [vmem:[#allocation5 + $0x11] ss:$0 sm:$0xff] }
 0x3b1   :  { %968 = vmatmul.bf16.vlgmr.msra.gmra.mxu0 %v874_v23  ;;  %982 = vmatmul.bf16.vlgmr.msra.gmra.mxu1 %v874_v23 }
 0x42e   :  { %v969_v37 = vpop.f32.mrf.mxu0  ;;  %v983_v38 = vpop.f32.mrf.mxu1 }
 0x42f   :  { %v970_v41 = vadd.f32 %v969_v37, %v876_v39  ;;  %v984_v42 = vadd.f32 %v983_v38, %v877_v40 }
 0x431   :  { %v988_v47 = vmax.f32 %v970_v41, 0.0  ;;  %v989_v48 = vmax.f32 %v984_v42, 0.0 }
 0x436   :  { %v971_v43 = vpop.f32.mrf.mxu0  ;;  %v985_v44 = vpop.f32.mrf.mxu1 }
 0x437   :  { %v972_v45 = vadd.f32 %v971_v43, %v876_v39  ;;  %v986_v46 = vadd.f32 %v985_v44, %v877_v40 }
 0x439   :  { %v990_v49 = vmax.f32 %v972_v45, 0.0  ;;  %v991_v50 = vmax.f32 %v986_v46, 0.0 }
 0x43b   :  { %v1025_v51 = vpack.c.bf16 %v990_v49, %v988_v47  ;;  %v1026_v52 = vpack.c.bf16 %v991_v50, %v989_v48 }
 0x43d   :  { %1131 = vmatmul.bf16.vlgmr.msra.gmra.mxu2 %v1025_v51  ;;  %1145 = vmatmul.bf16.vlgmr.msra.gmra.mxu3 %v1026_v52 }
 0x4c0   :  { %v1132_v61 = vpop.f32.mrf.mxu2  ;;  %v1146_v62 = vpop.f32.mrf.mxu3 }
 0x4c1   :  { %v1133_v0 = vadd.f32 %v1132_v61, %v1024_v63 }
 0x4c3   :  { %v1147_v2 = vadd.f32 %v1146_v62, %v1133_v0 }
 0x4c5   :  { %v1151_v6 = vmax.f32 %v1147_v2, 0.0 }
 0x4c8   :  { %v1134_v1 = vpop.f32.mrf.mxu2  ;;  %v1148_v4 = vpop.f32.mrf.mxu3 }
 0x4c9   :  { %v1135_v3 = vadd.f32 %v1134_v1, %v1024_v63 }
 0x4cb   :  { %v1149_v5 = vadd.f32 %v1148_v4, %v1135_v3 }
 0x4cd   :  { %v1152_v7 = vmax.f32 %v1149_v5, 0.0 }
 0x4cf   :  { %v1170_v8 = vpack.c.bf16 %v1152_v7, %v1151_v6 }
 0x4d1   :  { %1227 = vmatmul.bf16.vlgmr.msrb.gmra.mxu0 %v1170_v8 }
 0x54e   :  { %v1228_v13 = vpop.f32.mrf.mxu0 }
 0x54f   :  { %v1229_v15 = vadd.f32 %v1228_v13, %v1169_v14 }
 0x551   :  { %v1233_v18 = vmax.f32 %v1229_v15, 0.0 }
 0x556   :  { %v1230_v16 = vpop.f32.mrf.mxu0 }
 0x557   :  { %v1231_v17 = vadd.f32 %v1230_v16, %v1169_v14 }
 0x559   :  { %v1234_v19 = vmax.f32 %v1231_v17, 0.0 }
 0x55b   :  { %v1252_v20 = vpack.c.bf16 %v1234_v19, %v1233_v18 }
 0x55d   :  { %1309 = vmatmul.bf16.vlgmr.msrb.gmra.mxu1 %v1252_v20 }
 0x5da   :  { %v1310_v22 = vpop.f32.mrf.mxu1 }
 0x5db   :  { %v1311_v23 = vadd.f32 %v1310_v22, %v1251_v21 }
 0x5dd   :  { %1315 = vst [vmem:[#allocation22] sm:$0xff] %v1311_v23 }
 0x5e2   :  { %v1312_v24 = vpop.f32.mrf.mxu1 }
 0x5e3   :  { %v1313_v25 = vadd.f32 %v1312_v24, %v1251_v21 }
 0x5e5   :  { %1316 = vst [vmem:[#allocation22 + $0x8] sm:$0xff] %v1313_v25 }
 0x5e6   :  { %1329 = dma.vmem_to_hbm [thread:$0]  %s1322_s1, 256, %s1324_s3, [#allocation4], %s2259_s14, %s2259_s14, %s2260_s15  }
 0x5e7   :  { %2247 = dma.done.wait [#allocation4], 256  }
 0x5e8   :  { %2248 = vsyncadd [#allocation4], 4294967040 }
 0x5e9   :  { %1334 = vsyncpa [#allocation3], 1 }
 0x5ea   :  { %1335 = vsyncpa [#allocation6], 1 }
 0x5eb   :  { %1336 = vsyncpa [#allocation9], 1 }
 0x5ec   :  { %1337 = vsyncpa [#allocation12], 1 }
 0x5ed   :  { %1338 = vsyncpa [#allocation15], 1 }
 0x5ee   :  { %1339 = vsyncpa [#allocation18], 1 }
 0x5ef   :  { %1340 = vsyncpa [#allocation21], 1 }
 0x5f0   :  { %1341 = vsyncpa [#allocation4], 1 }

</bundles_post_ra>
